<compile_context>
chip_gen: v7x
topology: tpu7x:2x2x1
jax: 0.10.0
libtpu: 0.0.40
codegen_flags: <defaults>
</compile_context>

<pallas_src>
import functools

import jax
import jax.numpy as jnp
from jax.experimental import pallas as pl

# ---- model hyperparameters (from the PyTorch module) ------------------------
INPUT_DIM = 2
HIDDEN_DIM = 16
KERNEL_SIZE = 3
NUM_STEPS = 6
SEQ_LEN = 10
BATCH = 4


def neural_gpu_kernel(x_ref, w_in_ref, b_in_ref, conv_w_ref, conv_b_ref,
                      w_out_ref, b_out_ref, shifts_ref, o_ref,
                      *, num_steps, kernel_size):
    """Whole forward pass in one invocation; everything is a 2D (B*S, .) slab.

    x_ref:      (BS, Din)
    w_in_ref:   (Din, H)        (transposed nn.Linear weight)
    b_in_ref:   (1, H)
    conv_w_ref: (K, H, H)       conv_w[k] = torch_conv_weight[:, :, k].T
    conv_b_ref: (1, H)
    w_out_ref:  (H, Din)        (transposed nn.Linear weight)
    b_out_ref:  (1, Din)
    shifts_ref: (K, BS, BS)     0/1 tap-shift matrices; batch boundaries and
                                zero padding are baked in (identity at k=pad).
    o_ref:      (BS, Din)
    """
    pad = kernel_size // 2
    BS = x_ref.shape[0]
    H = w_in_ref.shape[1]

    # Hoist every weight/bias load — and the only broadcast — out of the
    # unrolled recurrent loop.
    w_taps = [conv_w_ref[k] for k in range(kernel_size)]                   # K x (H, H)
    shift_mats = {k: shifts_ref[k] for k in range(kernel_size) if k != pad}
    conv_bias = jnp.broadcast_to(conv_b_ref[...], (BS, H))                 # (BS, H)
    w_in = w_in_ref[...]
    w_out = w_out_ref[...]

    # Input projection: one 2D dot for the whole batch.
    h = jnp.dot(x_ref[...], w_in,
                preferred_element_type=jnp.float32) + b_in_ref[...]        # (BS, H)

    # num_steps x (Conv1d + ReLU), per-tap accumulation; all shifts via the
    # precomputed 0/1 shift matrices on the (idle) MXU.
    for _ in range(num_steps):
        y = conv_bias
        for k in range(kernel_size):
            hk = h if k == pad else jnp.dot(shift_mats[k], h,
                                            preferred_element_type=jnp.float32)
            y = y + jnp.dot(hk, w_taps[k], preferred_element_type=jnp.float32)
        h = jnp.maximum(y, 0.0)                                            # ReLU

    # Output projection + single store.
    out = jnp.dot(h, w_out,
                  preferred_element_type=jnp.float32) + b_out_ref[...]
    o_ref[...] = out.astype(o_ref.dtype)


def _build_shift_matrices(batch, seq_len, kernel_size):
    """shifts[k][r, c] = 1 iff output row r takes tap k from input row c.

    Row indices are flattened (batch * seq); taps never cross a batch
    boundary (those contributions read the implicit zero padding).
    """
    pad = kernel_size // 2
    bs = batch * seq_len
    rows = jnp.arange(bs)
    seq = rows % seq_len
    cols = jnp.arange(bs)
    mats = []
    for k in range(kernel_size):
        d = k - pad
        valid = (seq + d >= 0) & (seq + d < seq_len)                       # in-sequence
        src = rows + d
        mat = (cols[None, :] == src[:, None]) & valid[:, None]
        mats.append(mat.astype(jnp.float32))
    return jnp.stack(mats)                                                 # (K, BS, BS)


def neural_gpu_forward(x, params):
    """x: (B, S, Din) float32 -> (B, S, Din) float32."""
    B, S, Din = x.shape
    w_in, b_in, conv_w, conv_b, w_out, b_out = params
    H = w_in.shape[1]
    K = conv_w.shape[0]
    BS = B * S

    # TODO(synk): assumes odd kernel_size (PyTorch Conv1d with padding=K//2
    # changes the sequence length for even K, which this kernel does not model).
    shifts = _build_shift_matrices(B, S, K)

    kernel = functools.partial(neural_gpu_kernel,
                               num_steps=NUM_STEPS, kernel_size=K)

    out2d = pl.pallas_call(
        kernel,
        out_shape=jax.ShapeDtypeStruct((BS, Din), jnp.float32),
    )(x.reshape(BS, Din),
      w_in,
      b_in.reshape(1, H),
      conv_w,
      conv_b.reshape(1, H),
      w_out,
      b_out.reshape(1, Din),
      shifts)

    return out2d.reshape(B, S, Din)


def init_params(key, input_dim, hidden_dim, kernel_size):
    """Deterministic synthetic parameter init (matches PyTorch shapes)."""
    k1, k2, k3, k4, k5, k6 = jax.random.split(key, 6)
    # nn.Linear(input_dim, hidden_dim): weight (H, Din), bias (H,)
    w_in_t = jax.random.normal(k1, (input_dim, hidden_dim), jnp.float32) * 0.3
    b_in = jax.random.normal(k2, (1, hidden_dim), jnp.float32) * 0.1
    # nn.Conv1d(H, H, K): weight (H_out, H_in, K), bias (H,)
    conv_w_torch = jax.random.normal(
        k3, (hidden_dim, hidden_dim, kernel_size), jnp.float32) * 0.15
    conv_b = jax.random.normal(k4, (1, hidden_dim), jnp.float32) * 0.1
    # rearrange to (K, H_in, H_out) so y += shifted @ conv_w[k]
    conv_w = jnp.transpose(conv_w_torch, (2, 1, 0))
    # nn.Linear(hidden_dim, input_dim): weight (Din, H), bias (Din,)
    w_out_t = jax.random.normal(k5, (hidden_dim, input_dim), jnp.float32) * 0.3
    b_out = jax.random.normal(k6, (1, input_dim), jnp.float32) * 0.1
    return (w_in_t, b_in, conv_w, conv_b, w_out_t, b_out)


def neural_gpu_reference(x, params):
    """Pure-JAX reference (same math, no Pallas) for validation."""
    w_in, b_in, conv_w, conv_b, w_out, b_out = params
    h = x @ w_in + b_in                                    # (B, S, H)
    B, S, H = h.shape
    K = conv_w.shape[0]
    pad = K // 2
    for _ in range(NUM_STEPS):
        padded = jnp.pad(h, ((0, 0), (pad, pad), (0, 0)))
        y = jnp.broadcast_to(conv_b, (B, S, H))
        for k in range(K):
            y = y + padded[:, k:k + S, :] @ conv_w[k]
        h = jnp.maximum(y, 0.0)
    return h @ w_out + b_out


if __name__ == "__main__":
    key = jax.random.PRNGKey(0)
    k_param, k_x = jax.random.split(key)

    params = init_params(k_param, INPUT_DIM, HIDDEN_DIM, KERNEL_SIZE)
    x = jax.random.normal(k_x, (BATCH, SEQ_LEN, INPUT_DIM), jnp.float32)

    out = neural_gpu_forward(x, params)
    out = jax.block_until_ready(out)

    ref = neural_gpu_reference(x, params)
    assert out.shape == (BATCH, SEQ_LEN, INPUT_DIM)
    assert jnp.allclose(out, ref, atol=1e-4, rtol=1e-4)

    print("KERNEL_OK")
</pallas_src>

<mosaic_0001>
module attributes {stable_mosaic.version = 11 : i64} {
  func.func @neural_gpu_kernel(%arg0: memref<40x2xf32, #tpu.memory_space<vmem>>, %arg1: memref<2x16xf32, #tpu.memory_space<vmem>>, %arg2: memref<1x16xf32, #tpu.memory_space<vmem>>, %arg3: memref<3x16x16xf32, #tpu.memory_space<vmem>>, %arg4: memref<1x16xf32, #tpu.memory_space<vmem>>, %arg5: memref<16x2xf32, #tpu.memory_space<vmem>>, %arg6: memref<1x2xf32, #tpu.memory_space<vmem>>, %arg7: memref<3x40x40xf32, #tpu.memory_space<vmem>>, %arg8: memref<40x2xf32, #tpu.memory_space<vmem>>) attributes {dimension_semantics = [], scalar_prefetch = 0 : i64, scratch_operands = 0 : i64, tpu.core_type = #tpu.core_type<tc>} {
    %c0 = arith.constant 0 : index
    %c0_0 = arith.constant 0 : index
    %c0_1 = arith.constant 0 : index
    %0 = vector.load %arg3[%c0, %c0_0, %c0_1] : memref<3x16x16xf32, #tpu.memory_space<vmem>>, vector<1x16x16xf32>
    %1 = vector.shape_cast %0 : vector<1x16x16xf32> to vector<16x16xf32>
    %c1 = arith.constant 1 : index
    %c0_2 = arith.constant 0 : index
    %c0_3 = arith.constant 0 : index
    %2 = vector.load %arg3[%c1, %c0_2, %c0_3] : memref<3x16x16xf32, #tpu.memory_space<vmem>>, vector<1x16x16xf32>
    %3 = vector.shape_cast %2 : vector<1x16x16xf32> to vector<16x16xf32>
    %c2 = arith.constant 2 : index
    %c0_4 = arith.constant 0 : index
    %c0_5 = arith.constant 0 : index
    %4 = vector.load %arg3[%c2, %c0_4, %c0_5] : memref<3x16x16xf32, #tpu.memory_space<vmem>>, vector<1x16x16xf32>
    %5 = vector.shape_cast %4 : vector<1x16x16xf32> to vector<16x16xf32>
    %c0_6 = arith.constant 0 : index
    %c0_7 = arith.constant 0 : index
    %c0_8 = arith.constant 0 : index
    %6 = vector.load %arg7[%c0_6, %c0_7, %c0_8] : memref<3x40x40xf32, #tpu.memory_space<vmem>>, vector<1x40x40xf32>
    %7 = vector.shape_cast %6 : vector<1x40x40xf32> to vector<40x40xf32>
    %c2_9 = arith.constant 2 : index
    %c0_10 = arith.constant 0 : index
    %c0_11 = arith.constant 0 : index
    %8 = vector.load %arg7[%c2_9, %c0_10, %c0_11] : memref<3x40x40xf32, #tpu.memory_space<vmem>>, vector<1x40x40xf32>
    %9 = vector.shape_cast %8 : vector<1x40x40xf32> to vector<40x40xf32>
    %c0_12 = arith.constant 0 : index
    %c0_13 = arith.constant 0 : index
    %10 = vector.load %arg4[%c0_12, %c0_13] : memref<1x16xf32, #tpu.memory_space<vmem>>, vector<1x16xf32>
    %11 = vector.shape_cast %10 : vector<1x16xf32> to vector<1x16xf32>
    %12 = vector.broadcast %11 : vector<1x16xf32> to vector<40x16xf32>
    %c0_14 = arith.constant 0 : index
    %c0_15 = arith.constant 0 : index
    %13 = vector.load %arg1[%c0_14, %c0_15] : memref<2x16xf32, #tpu.memory_space<vmem>>, vector<2x16xf32>
    %c0_16 = arith.constant 0 : index
    %c0_17 = arith.constant 0 : index
    %14 = vector.load %arg5[%c0_16, %c0_17] : memref<16x2xf32, #tpu.memory_space<vmem>>, vector<16x2xf32>
    %c0_18 = arith.constant 0 : index
    %c0_19 = arith.constant 0 : index
    %15 = vector.load %arg0[%c0_18, %c0_19] : memref<40x2xf32, #tpu.memory_space<vmem>>, vector<40x2xf32>
    %cst = arith.constant dense<0.000000e+00> : vector<40x16xf32>
    %16 = tpu.matmul %15, %13, %cst {dimension_numbers = #tpu.dot_dimension_numbers<[1], [0], [0], [1], [0, 0, 1, 1], [], []>} : vector<40x2xf32>, vector<2x16xf32>, vector<40x16xf32> -> vector<40x16xf32>
    %c0_20 = arith.constant 0 : index
    %c0_21 = arith.constant 0 : index
    %17 = vector.load %arg2[%c0_20, %c0_21] : memref<1x16xf32, #tpu.memory_space<vmem>>, vector<1x16xf32>
    %18 = vector.broadcast %17 : vector<1x16xf32> to vector<40x16xf32>
    %19 = arith.addf %16, %18 : vector<40x16xf32>
    %cst_22 = arith.constant dense<0.000000e+00> : vector<40x16xf32>
    %20 = tpu.matmul %7, %19, %cst_22 {dimension_numbers = #tpu.dot_dimension_numbers<[1], [0], [0], [1], [0, 0, 1, 1], [], []>} : vector<40x40xf32>, vector<40x16xf32>, vector<40x16xf32> -> vector<40x16xf32>
    %cst_23 = arith.constant dense<0.000000e+00> : vector<40x16xf32>
    %21 = tpu.matmul %20, %1, %cst_23 {dimension_numbers = #tpu.dot_dimension_numbers<[1], [0], [0], [1], [0, 0, 1, 1], [], []>} : vector<40x16xf32>, vector<16x16xf32>, vector<40x16xf32> -> vector<40x16xf32>
    %22 = arith.addf %12, %21 : vector<40x16xf32>
    %cst_24 = arith.constant dense<0.000000e+00> : vector<40x16xf32>
    %23 = tpu.matmul %19, %3, %cst_24 {dimension_numbers = #tpu.dot_dimension_numbers<[1], [0], [0], [1], [0, 0, 1, 1], [], []>} : vector<40x16xf32>, vector<16x16xf32>, vector<40x16xf32> -> vector<40x16xf32>
    %24 = arith.addf %22, %23 : vector<40x16xf32>
    %cst_25 = arith.constant dense<0.000000e+00> : vector<40x16xf32>
    %25 = tpu.matmul %9, %19, %cst_25 {dimension_numbers = #tpu.dot_dimension_numbers<[1], [0], [0], [1], [0, 0, 1, 1], [], []>} : vector<40x40xf32>, vector<40x16xf32>, vector<40x16xf32> -> vector<40x16xf32>
    %cst_26 = arith.constant dense<0.000000e+00> : vector<40x16xf32>
    %26 = tpu.matmul %25, %5, %cst_26 {dimension_numbers = #tpu.dot_dimension_numbers<[1], [0], [0], [1], [0, 0, 1, 1], [], []>} : vector<40x16xf32>, vector<16x16xf32>, vector<40x16xf32> -> vector<40x16xf32>
    %27 = arith.addf %24, %26 : vector<40x16xf32>
    %cst_27 = arith.constant 0.000000e+00 : f32
    %28 = vector.broadcast %cst_27 : f32 to vector<40x16xf32>
    %29 = arith.maximumf %27, %28 : vector<40x16xf32>
    %cst_28 = arith.constant dense<0.000000e+00> : vector<40x16xf32>
    %30 = tpu.matmul %7, %29, %cst_28 {dimension_numbers = #tpu.dot_dimension_numbers<[1], [0], [0], [1], [0, 0, 1, 1], [], []>} : vector<40x40xf32>, vector<40x16xf32>, vector<40x16xf32> -> vector<40x16xf32>
    %cst_29 = arith.constant dense<0.000000e+00> : vector<40x16xf32>
    %31 = tpu.matmul %30, %1, %cst_29 {dimension_numbers = #tpu.dot_dimension_numbers<[1], [0], [0], [1], [0, 0, 1, 1], [], []>} : vector<40x16xf32>, vector<16x16xf32>, vector<40x16xf32> -> vector<40x16xf32>
    %32 = arith.addf %12, %31 : vector<40x16xf32>
    %cst_30 = arith.constant dense<0.000000e+00> : vector<40x16xf32>
    %33 = tpu.matmul %29, %3, %cst_30 {dimension_numbers = #tpu.dot_dimension_numbers<[1], [0], [0], [1], [0, 0, 1, 1], [], []>} : vector<40x16xf32>, vector<16x16xf32>, vector<40x16xf32> -> vector<40x16xf32>
    %34 = arith.addf %32, %33 : vector<40x16xf32>
    %cst_31 = arith.constant dense<0.000000e+00> : vector<40x16xf32>
    %35 = tpu.matmul %9, %29, %cst_31 {dimension_numbers = #tpu.dot_dimension_numbers<[1], [0], [0], [1], [0, 0, 1, 1], [], []>} : vector<40x40xf32>, vector<40x16xf32>, vector<40x16xf32> -> vector<40x16xf32>
    %cst_32 = arith.constant dense<0.000000e+00> : vector<40x16xf32>
    %36 = tpu.matmul %35, %5, %cst_32 {dimension_numbers = #tpu.dot_dimension_numbers<[1], [0], [0], [1], [0, 0, 1, 1], [], []>} : vector<40x16xf32>, vector<16x16xf32>, vector<40x16xf32> -> vector<40x16xf32>
    %37 = arith.addf %34, %36 : vector<40x16xf32>
    %cst_33 = arith.constant 0.000000e+00 : f32
    %38 = vector.broadcast %cst_33 : f32 to vector<40x16xf32>
    %39 = arith.maximumf %37, %38 : vector<40x16xf32>
    %cst_34 = arith.constant dense<0.000000e+00> : vector<40x16xf32>
    %40 = tpu.matmul %7, %39, %cst_34 {dimension_numbers = #tpu.dot_dimension_numbers<[1], [0], [0], [1], [0, 0, 1, 1], [], []>} : vector<40x40xf32>, vector<40x16xf32>, vector<40x16xf32> -> vector<40x16xf32>
    %cst_35 = arith.constant dense<0.000000e+00> : vector<40x16xf32>
    %41 = tpu.matmul %40, %1, %cst_35 {dimension_numbers = #tpu.dot_dimension_numbers<[1], [0], [0], [1], [0, 0, 1, 1], [], []>} : vector<40x16xf32>, vector<16x16xf32>, vector<40x16xf32> -> vector<40x16xf32>
    %42 = arith.addf %12, %41 : vector<40x16xf32>
    %cst_36 = arith.constant dense<0.000000e+00> : vector<40x16xf32>
    %43 = tpu.matmul %39, %3, %cst_36 {dimension_numbers = #tpu.dot_dimension_numbers<[1], [0], [0], [1], [0, 0, 1, 1], [], []>} : vector<40x16xf32>, vector<16x16xf32>, vector<40x16xf32> -> vector<40x16xf32>
    %44 = arith.addf %42, %43 : vector<40x16xf32>
    %cst_37 = arith.constant dense<0.000000e+00> : vector<40x16xf32>
    %45 = tpu.matmul %9, %39, %cst_37 {dimension_numbers = #tpu.dot_dimension_numbers<[1], [0], [0], [1], [0, 0, 1, 1], [], []>} : vector<40x40xf32>, vector<40x16xf32>, vector<40x16xf32> -> vector<40x16xf32>
    %cst_38 = arith.constant dense<0.000000e+00> : vector<40x16xf32>
    %46 = tpu.matmul %45, %5, %cst_38 {dimension_numbers = #tpu.dot_dimension_numbers<[1], [0], [0], [1], [0, 0, 1, 1], [], []>} : vector<40x16xf32>, vector<16x16xf32>, vector<40x16xf32> -> vector<40x16xf32>
    %47 = arith.addf %44, %46 : vector<40x16xf32>
    %cst_39 = arith.constant 0.000000e+00 : f32
    %48 = vector.broadcast %cst_39 : f32 to vector<40x16xf32>
    %49 = arith.maximumf %47, %48 : vector<40x16xf32>
    %cst_40 = arith.constant dense<0.000000e+00> : vector<40x16xf32>
    %50 = tpu.matmul %7, %49, %cst_40 {dimension_numbers = #tpu.dot_dimension_numbers<[1], [0], [0], [1], [0, 0, 1, 1], [], []>} : vector<40x40xf32>, vector<40x16xf32>, vector<40x16xf32> -> vector<40x16xf32>
    %cst_41 = arith.constant dense<0.000000e+00> : vector<40x16xf32>
    %51 = tpu.matmul %50, %1, %cst_41 {dimension_numbers = #tpu.dot_dimension_numbers<[1], [0], [0], [1], [0, 0, 1, 1], [], []>} : vector<40x16xf32>, vector<16x16xf32>, vector<40x16xf32> -> vector<40x16xf32>
    %52 = arith.addf %12, %51 : vector<40x16xf32>
    %cst_42 = arith.constant dense<0.000000e+00> : vector<40x16xf32>
    %53 = tpu.matmul %49, %3, %cst_42 {dimension_numbers = #tpu.dot_dimension_numbers<[1], [0], [0], [1], [0, 0, 1, 1], [], []>} : vector<40x16xf32>, vector<16x16xf32>, vector<40x16xf32> -> vector<40x16xf32>
    %54 = arith.addf %52, %53 : vector<40x16xf32>
    %cst_43 = arith.constant dense<0.000000e+00> : vector<40x16xf32>
    %55 = tpu.matmul %9, %49, %cst_43 {dimension_numbers = #tpu.dot_dimension_numbers<[1], [0], [0], [1], [0, 0, 1, 1], [], []>} : vector<40x40xf32>, vector<40x16xf32>, vector<40x16xf32> -> vector<40x16xf32>
    %cst_44 = arith.constant dense<0.000000e+00> : vector<40x16xf32>
    %56 = tpu.matmul %55, %5, %cst_44 {dimension_numbers = #tpu.dot_dimension_numbers<[1], [0], [0], [1], [0, 0, 1, 1], [], []>} : vector<40x16xf32>, vector<16x16xf32>, vector<40x16xf32> -> vector<40x16xf32>
    %57 = arith.addf %54, %56 : vector<40x16xf32>
    %cst_45 = arith.constant 0.000000e+00 : f32
    %58 = vector.broadcast %cst_45 : f32 to vector<40x16xf32>
    %59 = arith.maximumf %57, %58 : vector<40x16xf32>
    %cst_46 = arith.constant dense<0.000000e+00> : vector<40x16xf32>
    %60 = tpu.matmul %7, %59, %cst_46 {dimension_numbers = #tpu.dot_dimension_numbers<[1], [0], [0], [1], [0, 0, 1, 1], [], []>} : vector<40x40xf32>, vector<40x16xf32>, vector<40x16xf32> -> vector<40x16xf32>
    %cst_47 = arith.constant dense<0.000000e+00> : vector<40x16xf32>
    %61 = tpu.matmul %60, %1, %cst_47 {dimension_numbers = #tpu.dot_dimension_numbers<[1], [0], [0], [1], [0, 0, 1, 1], [], []>} : vector<40x16xf32>, vector<16x16xf32>, vector<40x16xf32> -> vector<40x16xf32>
    %62 = arith.addf %12, %61 : vector<40x16xf32>
    %cst_48 = arith.constant dense<0.000000e+00> : vector<40x16xf32>
    %63 = tpu.matmul %59, %3, %cst_48 {dimension_numbers = #tpu.dot_dimension_numbers<[1], [0], [0], [1], [0, 0, 1, 1], [], []>} : vector<40x16xf32>, vector<16x16xf32>, vector<40x16xf32> -> vector<40x16xf32>
    %64 = arith.addf %62, %63 : vector<40x16xf32>
    %cst_49 = arith.constant dense<0.000000e+00> : vector<40x16xf32>
    %65 = tpu.matmul %9, %59, %cst_49 {dimension_numbers = #tpu.dot_dimension_numbers<[1], [0], [0], [1], [0, 0, 1, 1], [], []>} : vector<40x40xf32>, vector<40x16xf32>, vector<40x16xf32> -> vector<40x16xf32>
    %cst_50 = arith.constant dense<0.000000e+00> : vector<40x16xf32>
    %66 = tpu.matmul %65, %5, %cst_50 {dimension_numbers = #tpu.dot_dimension_numbers<[1], [0], [0], [1], [0, 0, 1, 1], [], []>} : vector<40x16xf32>, vector<16x16xf32>, vector<40x16xf32> -> vector<40x16xf32>
    %67 = arith.addf %64, %66 : vector<40x16xf32>
    %cst_51 = arith.constant 0.000000e+00 : f32
    %68 = vector.broadcast %cst_51 : f32 to vector<40x16xf32>
    %69 = arith.maximumf %67, %68 : vector<40x16xf32>
    %cst_52 = arith.constant dense<0.000000e+00> : vector<40x16xf32>
    %70 = tpu.matmul %7, %69, %cst_52 {dimension_numbers = #tpu.dot_dimension_numbers<[1], [0], [0], [1], [0, 0, 1, 1], [], []>} : vector<40x40xf32>, vector<40x16xf32>, vector<40x16xf32> -> vector<40x16xf32>
    %cst_53 = arith.constant dense<0.000000e+00> : vector<40x16xf32>
    %71 = tpu.matmul %70, %1, %cst_53 {dimension_numbers = #tpu.dot_dimension_numbers<[1], [0], [0], [1], [0, 0, 1, 1], [], []>} : vector<40x16xf32>, vector<16x16xf32>, vector<40x16xf32> -> vector<40x16xf32>
    %72 = arith.addf %12, %71 : vector<40x16xf32>
    %cst_54 = arith.constant dense<0.000000e+00> : vector<40x16xf32>
    %73 = tpu.matmul %69, %3, %cst_54 {dimension_numbers = #tpu.dot_dimension_numbers<[1], [0], [0], [1], [0, 0, 1, 1], [], []>} : vector<40x16xf32>, vector<16x16xf32>, vector<40x16xf32> -> vector<40x16xf32>
    %74 = arith.addf %72, %73 : vector<40x16xf32>
    %cst_55 = arith.constant dense<0.000000e+00> : vector<40x16xf32>
    %75 = tpu.matmul %9, %69, %cst_55 {dimension_numbers = #tpu.dot_dimension_numbers<[1], [0], [0], [1], [0, 0, 1, 1], [], []>} : vector<40x40xf32>, vector<40x16xf32>, vector<40x16xf32> -> vector<40x16xf32>
    %cst_56 = arith.constant dense<0.000000e+00> : vector<40x16xf32>
    %76 = tpu.matmul %75, %5, %cst_56 {dimension_numbers = #tpu.dot_dimension_numbers<[1], [0], [0], [1], [0, 0, 1, 1], [], []>} : vector<40x16xf32>, vector<16x16xf32>, vector<40x16xf32> -> vector<40x16xf32>
    %77 = arith.addf %74, %76 : vector<40x16xf32>
    %cst_57 = arith.constant 0.000000e+00 : f32
    %78 = vector.broadcast %cst_57 : f32 to vector<40x16xf32>
    %79 = arith.maximumf %77, %78 : vector<40x16xf32>
    %cst_58 = arith.constant dense<0.000000e+00> : vector<40x2xf32>
    %80 = tpu.matmul %79, %14, %cst_58 {dimension_numbers = #tpu.dot_dimension_numbers<[1], [0], [0], [1], [0, 0, 1, 1], [], []>} : vector<40x16xf32>, vector<16x2xf32>, vector<40x2xf32> -> vector<40x2xf32>
    %c0_59 = arith.constant 0 : index
    %c0_60 = arith.constant 0 : index
    %81 = vector.load %arg6[%c0_59, %c0_60] : memref<1x2xf32, #tpu.memory_space<vmem>>, vector<1x2xf32>
    %82 = vector.broadcast %81 : vector<1x2xf32> to vector<40x2xf32>
    %83 = arith.addf %80, %82 : vector<40x2xf32>
    %c0_61 = arith.constant 0 : index
    %c0_62 = arith.constant 0 : index
    %84 = vector.load %arg8[%c0_61, %c0_62] : memref<40x2xf32, #tpu.memory_space<vmem>>, vector<40x2xf32>
    tpu.vector_store %arg8[%c0_61, %c0_62], %83 {strides = array<i32>} : memref<40x2xf32, #tpu.memory_space<vmem>>, vector<40x2xf32>,
    return
  }
}

</mosaic_0001>

<bundles_post_ra>
// kernel: tpu_custom_call.1
= control target key start
LH: loop header
LB: loop body
LE: loop exit
PB: predicated region body
PF: predicated region fallthrough
CT: control target
= control target key end

     0   :  { %13 = vsyncpa [#allocation3], 0  ;;  %s4869_s27 = smov [#allocation2]   ;;  %s5853_s0 = inlined_call_operand.vmem [shape: f32[40,2], index: 0, kind: input, shape index: {}]   ;;  %s5854_s1 = inlined_call_operand.vmem [shape: f32[2,16], index: 1, kind: input, shape index: {}]   ;;  %s5855_s2 = inlined_call_operand.vmem [shape: f32[1,16], index: 2, kind: input, shape index: {}]   ;;  %s5856_s3 = inlined_call_operand.vmem [shape: f32[3,16,16], index: 3, kind: input, shape index: {}]   ;;  %s5857_s4 = inlined_call_operand.vmem [shape: f32[1,16], index: 4, kind: input, shape index: {}]   ;;  %s5858_s5 = inlined_call_operand.vmem [shape: f32[16,2], index: 5, kind: input, shape index: {}]   ;;  %s5859_s6 = inlined_call_operand.vmem [shape: f32[1,2], index: 6, kind: input, shape index: {}]   ;;  %s5860_s7 = inlined_call_operand.hbm [shape: f32[3,40,40], index: 7, kind: input, shape index: {}]   ;;  %s5861_s8 = inlined_call_operand.vmem [shape: f32[40,2], index: 8, kind: output, shape index: {}]  }
   0x1   :  { %s33_s28 = sshll.u32 %s4869_s27, 4  ;;  %s4845_s9 = scalar_lea.hbm %s5860_s7, 1920  ;;  %s34_s28 = int_to_ptr.vmem [resolvable:$true] %s33_s28 }
   0x2   :  { %p4846_p0 = scmp.ne.s32.totalorder %s5860_s7, %s4845_s9  ;;  %p4849_p1 = scmp.lt.u32.totalorder %s4845_s9, %s5860_s7 }
   0x4   :  { %p4851_p2 = pnand %p4849_p1, %p4846_p0 }
   0x6   :  { %4854 = shalt.err (!%p4851_p2)
}
   0x7   :  { %s4855_s14 = scalar_lea.vmem %s34_s28, 1920  ;;  %p4860_p4 = scmp.lt.s32.totalorder %s34_s28, %s34_s28 }
   0x8   :  { %p4856_p3 = scmp.ne.s32.totalorder %s34_s28, %s4855_s14  ;;  %p4861_p5 = scmp.lt.s32.totalorder %s4855_s14, %s4855_s14 }
   0xa   :  { %p4862_p6 = por %p4861_p5, %p4860_p4 }
   0xc   :  { %p4863_p7 = pnand %p4862_p6, %p4856_p3 }
   0xe   :  { %4866 = shalt.err (!%p4863_p7)
}
   0xf   :  { %s4870_s15 = smov 128   ;;  %s4871_s16 = smov 8  }
  0x10   :  { %39 = dma.hbm_to_vmem [thread:$0]  %s5860_s7, 1920, %s34_s28, [#allocation3], %s4870_s15, %s4870_s15, %s4871_s16  }
  0x11   :  { %4867 = dma.done.wait [#allocation3], 1920  }
  0x12   :  { %4868 = vsyncadd [#allocation3], 4294965376  ;;  %v4872_v0 = vmov 0.0   ;;  %vm4873_vm0 = vmmov 0   ;;  %vm100_vm1 = vcmask 1041408   ;;  %vm84_vm2 = vcmask 15360  }
  0x13   :  { %3865 = vmatprep.subr.mxu0 %v4872_v0  ;;  %3867 = vmatprep.mubr.msk.f32.mxu0 %vm4873_vm0, %v4872_v0  ;;  %v69_v1 = vld [vmem:[%s5854_s1] sm:$0x3]  ;;  %v73_v3 = vld [vmem:[%s5853_s0 + $0x8] sm:$0xff]  ;;  %v74_v4 = vld [vmem:[%s5853_s0 + $0x10] sm:$0xff]  ;;  %v4874_v7 = vmov 0.0|0.0   ;;  %vm194_vm3 = vcmask 326656  }
  0x14   :  { %3895 = vmatprep.mubr.msk.f32.mxu1 %vm4873_vm0, %v4872_v0  ;;  %v72_v2 = vld [vmem:[%s5853_s0] sm:$0xff]  ;;  %3866 = vmatpush3.msk.msra.mxu0 %vm100_vm1, %v69_v1  ;;  %v75_v5 = vld [vmem:[%s5853_s0 + $0x18] sm:$0xff]  ;;  %v44_v27 = vld [vmem:[%s5856_s3 + $0x8] sm:$0xff]  ;;  %vm300_vm4 = vcmask 130048  }
  0x15   :  { %3868 = vmatmul.mubr.msk.f32.vlgmr.msra.gmra.mrb[0].mxu0 %vm84_vm2, %v72_v2  ;;  %v76_v6 = vld [vmem:[%s5853_s0 + $0x20] sm:$0xff]  ;;  %4543 = vmatprep.subr.bf16.mxu0 %v4874_v7  ;;  %v5001_v29 = vld [vmem:[#allocation2 + $0x8] sm:$0xff]  ;;  %v5015_v31 = vld [vmem:[#allocation2 + $0x10] sm:$0xff] }
  0x16   :  { %3870 = vmatprep.mubr.msk.f32.mxu0 %vm4873_vm0, %v4872_v0  ;;  %4672 = vmatprep.subr.bf16.mxu1 %v4874_v7  ;;  %v3443_v10 = vld [vmem:[%s5855_s2] ss:$0 sm:$0xff]  ;;  %v5026_v32 = vld [vmem:[#allocation2 + $0x18] sm:$0xff]  ;;  %v5041_v34 = vld [vmem:[#allocation2 + $0x50] sm:$0xff] }
  0x17   :  { %v43_v26 = vld [vmem:[%s5856_s3] sm:$0xff]  ;;  %v5047_v35 = vld [vmem:[#allocation2 + $0x58] sm:$0xff]  ;;  %v5059_v37 = vld [vmem:[#allocation2 + $0x68] sm:$0xff] }
  0x18   :  { %v4999_v28 = vld [vmem:[#allocation2] sm:$0xff]  ;;  %v5005_v30 = vpack.c.bf16 %v44_v27, %v43_v26  ;;  %v5065_v38 = vld [vmem:[#allocation2 + $0x70] sm:$0xff]  ;;  %v3439_v40 = vld [vmem:[%s5856_s3 + $0x18] sm:$0xff] }
  0x19   :  { %3871 = vmatmul.mubr.msk.f32.gmra.mrb[2].mxu0 %vm84_vm2, %v73_v3  ;;  %v5034_v33 = vld [vmem:[#allocation2 + $0x20] sm:$0xff]  ;;  %v3438_v39 = vld [vmem:[%s5856_s3 + $0x10] sm:$0xff]  ;;  %v3441_v53 = vld [vmem:[%s5856_s3 + $0x28] sm:$0xff] }
  0x1a   :  { %3873 = vmatprep.mubr.msk.f32.mxu0 %vm4873_vm0, %v4872_v0  ;;  %v5053_v36 = vld [vmem:[#allocation2 + $0x60] sm:$0xff]  ;;  %v5077_v41 = vpack.c.bf16 %v3439_v40, %v3438_v39 }
  0x1b   :  { %v3440_v52 = vld [vmem:[%s5856_s3 + $0x20] sm:$0xff] }
  0x1c   :  { %v5102_v55 = vpack.c.bf16 %v3441_v53, %v3440_v52  ;;  %v5144_v2 = vld [vmem:[%s5857_s4] ss:$0 sm:$0xff] }
  0x1d   :  { %3874 = vmatmul.mubr.msk.f32.gmra.mrb[4].mxu0 %vm84_vm2, %v74_v4 }
  0x1e   :  { %3876 = vmatprep.mubr.msk.f32.mxu0 %vm4873_vm0, %v4872_v0 }
  0x21   :  { %3877 = vmatmul.mubr.msk.f32.gmra.mrb[6].mxu0 %vm84_vm2, %v75_v5 }
  0x22   :  { %3879 = vmatprep.mubr.msk.f32.mxu0 %vm4873_vm0, %v4872_v0 }
  0x25   :  { %3880 = vmatmul.mubr.msk.f32.gmra.mrb[8].mxu0 %vm84_vm2, %v76_v6 }
  0x26   :  { %3892 = vmatprep.mubr.msk.f32.mxu0 %vm4873_vm0, %v4872_v0 }
  0xe8   :  { %v170_v8 = vpop.f32.mrb[0].mxu0 }
  0xe9   :  { %v3869_v9 = vpop.f32.mrb[1].mxu0  ;;  %v4975_v12 = vadd.f32 %v3443_v10, %v170_v8 }
  0xec   :  { %v175_v11 = vpop.f32.mrb[2].mxu0 }
  0xed   :  { %v4977_v13 = vadd.f32 %v3443_v10, %v175_v11  ;;  %v3872_v14 = vpop.f32.mrb[3].mxu0 }
  0xef   :  { %v4544_v15 = vpack.c.bf16 %v4977_v13, %v4975_v12 }
  0xf0   :  { %v180_v16 = vpop.f32.mrb[4].mxu0 }
  0xf1   :  { %v3875_v17 = vpop.f32.mrb[5].mxu0  ;;  %4545 = vmatpush3.bf16.msra.mxu0 %v4544_v15  ;;  %4675 = vmatpush3.bf16.msra.mxu1 %v4544_v15  ;;  %v4983_v19 = vadd.f32 %v3443_v10, %v180_v16 }
  0xf2   :  { %4546 = vmatprep.subr.bf16.mxu0 %v4874_v7  ;;  %4673 = vmatprep.subr.bf16.mxu1 %v4874_v7 }
  0xf4   :  { %v185_v18 = vpop.f32.mrb[6].mxu0 }
  0xf5   :  { %v4985_v20 = vadd.f32 %v3443_v10, %v185_v18  ;;  %v3878_v21 = vpop.f32.mrb[7].mxu0 }
  0xf7   :  { %v4547_v22 = vpack.c.bf16 %v4985_v20, %v4983_v19 }
  0xf8   :  { %v190_v23 = vpop.f32.mrb[8].mxu0 }
  0xf9   :  { %v4989_v24 = vadd.f32 %v3443_v10, %v190_v23  ;;  %4548 = vmatpush3.bf16.msra.mxu0 %v4547_v22  ;;  %4676 = vmatpush3.bf16.msra.mxu1 %v4547_v22  ;;  %v3881_v25 = vpop.f32.mrb[9].mxu0 }
  0xfa   :  { %3890 = vmatprep.subr.mxu0 %v4872_v0  ;;  %4674 = vmatprep.subr.mxu1 %v4872_v0 }
  0xfd   :  { %3891 = vmatpush3.msra.mxu0 %v4989_v24  ;;  %4677 = vmatpush3.msra.mxu1 %v4989_v24 }
  0xfe   :  { %3893 = vmatmul.mubr.msk.f32.vlgmr.msra.gmra.mrb[10].mxu0 %vm194_vm3, %v4999_v28  ;;  %4555 = vmatprep.subr.bf16.mxu1 %v4874_v7 }
  0xff   :  { %3896 = vmatmul.mubr.msk.f32.vlgmr.msra.gmra.mrb[0].mxu1 %vm194_vm3, %v5001_v29  ;;  %4549 = vmatprep.subr.bf16.mxu0 %v4874_v7 }
 0x100   :  { %4557 = vmatpush3.bf16.msra.mxu1 %v4544_v15  ;;  %3898 = vmatprep.mubr.msk.f32.mxu1 %vm4873_vm0, %v4872_v0 }
 0x101   :  { %4558 = vmatprep.subr.bf16.mxu1 %v4874_v7  ;;  %4551 = vmatpush3.bf16.msra.mxu0 %v5005_v30 }
 0x102   :  { %3911 = vmatprep.mubr.msk.f32.mxu0 %vm4873_vm0, %v4872_v0  ;;  %4552 = vmatprep.subr.bf16.mxu0 %v4874_v7 }
 0x103   :  { %3899 = vmatmul.mubr.msk.f32.gmra.mrb[2].mxu1 %vm194_vm3, %v5015_v31 }
 0x104   :  { %4560 = vmatpush3.bf16.msra.mxu1 %v4547_v22  ;;  %3901 = vmatprep.mubr.msk.f32.mxu1 %vm4873_vm0, %v4872_v0 }
 0x105   :  { %3953 = vmatprep.subr.mxu1 %v4872_v0 }
 0x107   :  { %3902 = vmatmul.mubr.msk.f32.gmra.mrb[4].mxu1 %vm194_vm3, %v5026_v32 }
 0x108   :  { %3954 = vmatpush3.msra.mxu1 %v4989_v24  ;;  %3904 = vmatprep.mubr.msk.f32.mxu1 %vm4873_vm0, %v4872_v0 }
 0x109   :  { %4564 = vmatprep.subr.bf16.mxu1 %v4874_v7 }
 0x10b   :  { %3905 = vmatmul.mubr.msk.f32.gmra.mrb[6].mxu1 %vm194_vm3, %v5034_v33 }
 0x10c   :  { %3955 = vmatprep.mubr.msk.f32.mxu1 %vm4873_vm0, %v4872_v0 }
 0x10f   :  { %3956 = vmatmul.mubr.msk.f32.vlgmr.msra.gmra.mrb[8].mxu1 %vm194_vm3, %v5041_v34 }
 0x110   :  { %3958 = vmatprep.mubr.msk.f32.mxu1 %vm4873_vm0, %v4872_v0 }
 0x113   :  { %3959 = vmatmul.mubr.msk.f32.gmra.mrb[10].mxu1 %vm194_vm3, %v5047_v35 }
 0x114   :  { %3961 = vmatprep.mubr.msk.f32.mxu1 %vm4873_vm0, %v4872_v0 }
 0x117   :  { %3962 = vmatmul.mubr.msk.f32.gmra.mrb[12].mxu1 %vm194_vm3, %v5053_v36 }
 0x118   :  { %3964 = vmatprep.mubr.msk.f32.mxu1 %vm4873_vm0, %v4872_v0 }
 0x11b   :  { %3965 = vmatmul.mubr.msk.f32.gmra.mrb[14].mxu1 %vm194_vm3, %v5059_v37 }
 0x11c   :  { %3967 = vmatprep.mubr.msk.f32.mxu1 %vm4873_vm0, %v4872_v0 }
 0x11f   :  { %3968 = vmatmul.mubr.msk.f32.gmra.mrb[16].mxu1 %vm194_vm3, %v5065_v38 }
 0x120   :  { %3999 = vmatprep.mubr.msk.f32.mxu1 %vm4873_vm0, %v4872_v0 }
 0x1d1   :  { %v276_v42 = vpop.f32.mrb[10].mxu0 }
 0x1d2   :  { %v3894_v43 = vpop.f32.mrb[11].mxu0  ;;  %3912 = vmatmul.mubr.msk.f32.vlgmr.msra.gmra.mrb[12].mxu0 %vm300_vm4, %v276_v42  ;;  %v281_v44 = vpop.f32.mrb[0].mxu1 }
 0x1d3   :  { %v3897_v45 = vpop.f32.mrb[1].mxu1  ;;  %3914 = vmatprep.mubr.msk.f32.mxu0 %vm4873_vm0, %v4872_v0  ;;  %4554 = vmatpush3.bf16.msra.mxu0 %v5077_v41 }
 0x1d4   :  { %4561 = vmatprep.subr.bf16.mxu0 %v4874_v7 }
 0x1d6   :  { %3915 = vmatmul.mubr.msk.f32.gmra.mrb[14].mxu0 %vm300_vm4, %v281_v44  ;;  %v286_v46 = vpop.f32.mrb[2].mxu1 }
 0x1d7   :  { %v3900_v47 = vpop.f32.mrb[3].mxu1  ;;  %3917 = vmatprep.mubr.msk.f32.mxu0 %vm4873_vm0, %v4872_v0 }
 0x1da   :  { %3918 = vmatmul.mubr.msk.f32.gmra.mrb[16].mxu0 %vm300_vm4, %v286_v46  ;;  %v291_v48 = vpop.f32.mrb[4].mxu1 }
 0x1db   :  { %v3903_v49 = vpop.f32.mrb[5].mxu1  ;;  %3920 = vmatprep.mubr.msk.f32.mxu0 %vm4873_vm0, %v4872_v0 }
 0x1de   :  { %3921 = vmatmul.mubr.msk.f32.gmra.mrb[18].mxu0 %vm300_vm4, %v291_v48  ;;  %v296_v50 = vpop.f32.mrb[6].mxu1 }
 0x1df   :  { %v3906_v51 = vpop.f32.mrb[7].mxu1  ;;  %3923 = vmatprep.mubr.msk.f32.mxu0 %vm4873_vm0, %v4872_v0 }
 0x1e2   :  { %3924 = vmatmul.mubr.msk.f32.gmra.mrb[20].mxu0 %vm300_vm4, %v296_v50  ;;  %v602_v54 = vpop.f32.mrb[8].mxu1 }
 0x1e3   :  { %3930 = vmatprep.mubr.msk.f32.mxu0 %vm4873_vm0, %v4872_v0  ;;  %v3957_v56 = vpop.f32.mrb[9].mxu1 }
 0x1e6   :  { %3931 = vmatmul.mubr.msk.f32.vlgmr.msra.gmra.mrb[12].mxu0 %vm300_vm4, %v4975_v12  ;;  %v607_v57 = vpop.f32.mrb[10].mxu1 }
 0x1e7   :  { %3933 = vmatprep.mubr.msk.f32.mxu0 %vm4873_vm0, %v4872_v0  ;;  %4563 = vmatpush3.bf16.msra.mxu0 %v5102_v55  ;;  %v3960_v58 = vpop.f32.mrb[11].mxu1 }
 0x1e8   :  { %4576 = vmatprep.subr.bf16.mxu0 %v4874_v7 }
 0x1ea   :  { %3934 = vmatmul.mubr.msk.f32.gmra.mrb[14].mxu0 %vm300_vm4, %v4977_v13  ;;  %v612_v59 = vpop.f32.mrb[12].mxu1 }
 0x1eb   :  { %3936 = vmatprep.mubr.msk.f32.mxu0 %vm4873_vm0, %v4872_v0  ;;  %v3963_v60 = vpop.f32.mrb[13].mxu1 }
 0x1ee   :  { %3937 = vmatmul.mubr.msk.f32.gmra.mrb[16].mxu0 %vm300_vm4, %v4983_v19  ;;  %v617_v61 = vpop.f32.mrb[14].mxu1 }
 0x1ef   :  { %3939 = vmatprep.mubr.msk.f32.mxu0 %vm4873_vm0, %v4872_v0  ;;  %v3966_v62 = vpop.f32.mrb[15].mxu1 }
 0x1f2   :  { %3940 = vmatmul.mubr.msk.f32.gmra.mrb[18].mxu0 %vm300_vm4, %v4985_v20  ;;  %v622_v63 = vpop.f32.mrb[16].mxu1 }
 0x1f3   :  { %3942 = vmatprep.mubr.msk.f32.mxu0 %vm4873_vm0, %v4872_v0  ;;  %v3969_v1 = vpop.f32.mrb[17].mxu1 }
 0x1f6   :  { %3943 = vmatmul.mubr.msk.f32.gmra.mrb[20].mxu0 %vm300_vm4, %v4989_v24 }
 0x1f7   :  { %3974 = vmatprep.mubr.msk.f32.mxu0 %vm4873_vm0, %v4872_v0 }
 0x1fa   :  { %3975 = vmatmul.mubr.msk.f32.vlgmr.msra.gmra.mrb[12].mxu0 %vm300_vm4, %v602_v54 }
 0x1fb   :  { %3977 = vmatprep.mubr.msk.f32.mxu0 %vm4873_vm0, %v4872_v0 }
 0x1fe   :  { %3978 = vmatmul.mubr.msk.f32.gmra.mrb[14].mxu0 %vm300_vm4, %v607_v57 }
 0x1ff   :  { %3980 = vmatprep.mubr.msk.f32.mxu0 %vm4873_vm0, %v4872_v0 }
 0x202   :  { %3981 = vmatmul.mubr.msk.f32.gmra.mrb[16].mxu0 %vm300_vm4, %v612_v59 }
 0x203   :  { %3983 = vmatprep.mubr.msk.f32.mxu0 %vm4873_vm0, %v4872_v0 }
 0x206   :  { %3984 = vmatmul.mubr.msk.f32.gmra.mrb[18].mxu0 %vm300_vm4, %v617_v61 }
 0x207   :  { %3986 = vmatprep.mubr.msk.f32.mxu0 %vm4873_vm0, %v4872_v0 }
 0x20a   :  { %3987 = vmatmul.mubr.msk.f32.gmra.mrb[20].mxu0 %vm300_vm4, %v622_v63 }
 0x20b   :  { %4062 = vmatprep.mubr.msk.f32.mxu0 %vm4873_vm0, %v4872_v0 }
 0x2cd   :  { %v707_v3 = vpop.f32.mrb[12].mxu0 }
 0x2ce   :  { %v3976_v4 = vpop.f32.mrb[13].mxu0  ;;  %v5147_v5 = vadd.f32 %v5144_v2, %v707_v3 }
 0x2d0   :  { %v736_v10 = vmax.f32 %v5147_v5, 0.0 }
 0x2d1   :  { %v712_v6 = vpop.f32.mrb[14].mxu0 }
 0x2d2   :  { %v5150_v8 = vadd.f32 %v5144_v2, %v712_v6  ;;  %v3979_v9 = vpop.f32.mrb[15].mxu0 }
 0x2d4   :  { %v737_v11 = vmax.f32 %v5150_v8, 0.0 }
 0x2d5   :  { %v717_v12 = vpop.f32.mrb[16].mxu0 }
 0x2d6   :  { %v4565_v13 = vpack.c.bf16 %v737_v11, %v736_v10  ;;  %v3982_v14 = vpop.f32.mrb[17].mxu0  ;;  %v5159_v15 = vadd.f32 %v5144_v2, %v717_v12 }
 0x2d8   :  { %4566 = vmatpush3.bf16.msra.mxu1 %v4565_v13  ;;  %4578 = vmatpush3.bf16.msra.mxu0 %v4565_v13  ;;  %v738_v19 = vmax.f32 %v5159_v15, 0.0 }
 0x2d9   :  { %v722_v16 = vpop.f32.mrb[18].mxu0  ;;  %4567 = vmatprep.subr.bf16.mxu1 %v4874_v7  ;;  %4579 = vmatprep.subr.bf16.mxu0 %v4874_v7 }
 0x2da   :  { %v5164_v17 = vadd.f32 %v5144_v2, %v722_v16  ;;  %v3985_v18 = vpop.f32.mrb[19].mxu0 }
 0x2dc   :  { %v739_v20 = vmax.f32 %v5164_v17, 0.0 }
 0x2dd   :  { %v727_v21 = vpop.f32.mrb[20].mxu0 }
 0x2de   :  { %v4568_v22 = vpack.c.bf16 %v739_v20, %v738_v19  ;;  %v4682_v23 = vadd.f32 %v5144_v2, %v727_v21  ;;  %v3988_v24 = vpop.f32.mrb[21].mxu0 }
 0x2e0   :  { %4569 = vmatpush3.bf16.msra.mxu1 %v4568_v22  ;;  %4581 = vmatpush3.bf16.msra.mxu0 %v4568_v22  ;;  %v5175_v25 = vmax.f32 %v4682_v23, 0.0 }
 0x2e1   :  { %3997 = vmatprep.subr.mxu1 %v4872_v0  ;;  %4060 = vmatprep.subr.mxu0 %v4872_v0 }
 0x2e4   :  { %3998 = vmatpush3.msra.mxu1 %v5175_v25  ;;  %4061 = vmatpush3.msra.mxu0 %v5175_v25 }
 0x2e5   :  { %4000 = vmatmul.mubr.msk.f32.vlgmr.msra.gmra.mrb[18].mxu1 %vm194_vm3, %v4999_v28  ;;  %4063 = vmatmul.mubr.msk.f32.vlgmr.msra.gmra.mrb[22].mxu0 %vm194_vm3, %v5041_v34 }
 0x2e6   :  { %4002 = vmatprep.mubr.msk.f32.mxu1 %vm4873_vm0, %v4872_v0  ;;  %4065 = vmatprep.mubr.msk.f32.mxu0 %vm4873_vm0, %v4872_v0 }
 0x2e7   :  { %4570 = vmatprep.subr.bf16.mxu1 %v4874_v7  ;;  %4585 = vmatprep.subr.bf16.mxu0 %v4874_v7 }
 0x2e8   :  { %4572 = vmatpush3.bf16.msra.mxu1 %v5005_v30 }
 0x2e9   :  { %4003 = vmatmul.mubr.msk.f32.gmra.mrb[20].mxu1 %vm194_vm3, %v5001_v29  ;;  %4066 = vmatmul.mubr.msk.f32.gmra.mrb[24].mxu0 %vm194_vm3, %v5047_v35 }
 0x2ea   :  { %4005 = vmatprep.mubr.msk.f32.mxu1 %vm4873_vm0, %v4872_v0  ;;  %4068 = vmatprep.mubr.msk.f32.mxu0 %vm4873_vm0, %v4872_v0 }
 0x2eb   :  { %4573 = vmatprep.subr.bf16.mxu1 %v4874_v7 }
 0x2ed   :  { %4006 = vmatmul.mubr.msk.f32.gmra.mrb[22].mxu1 %vm194_vm3, %v5015_v31  ;;  %4069 = vmatmul.mubr.msk.f32.gmra.mrb[26].mxu0 %vm194_vm3, %v5053_v36 }
 0x2ee   :  { %4008 = vmatprep.mubr.msk.f32.mxu1 %vm4873_vm0, %v4872_v0  ;;  %4071 = vmatprep.mubr.msk.f32.mxu0 %vm4873_vm0, %v4872_v0 }
 0x2f1   :  { %4009 = vmatmul.mubr.msk.f32.gmra.mrb[24].mxu1 %vm194_vm3, %v5026_v32  ;;  %4072 = vmatmul.mubr.msk.f32.gmra.mrb[28].mxu0 %vm194_vm3, %v5059_v37 }
 0x2f2   :  { %4011 = vmatprep.mubr.msk.f32.mxu1 %vm4873_vm0, %v4872_v0  ;;  %4074 = vmatprep.mubr.msk.f32.mxu0 %vm4873_vm0, %v4872_v0 }
 0x2f5   :  { %4012 = vmatmul.mubr.msk.f32.gmra.mrb[26].mxu1 %vm194_vm3, %v5034_v33  ;;  %4075 = vmatmul.mubr.msk.f32.gmra.mrb[30].mxu0 %vm194_vm3, %v5065_v38 }
 0x2f6   :  { %4018 = vmatprep.mubr.msk.f32.mxu1 %vm4873_vm0, %v4872_v0  ;;  %4106 = vmatprep.mubr.msk.f32.mxu0 %vm4873_vm0, %v4872_v0 }
 0x3b8   :  { %v807_v26 = vpop.f32.mrb[18].mxu1  ;;  %v1117_v27 = vpop.f32.mrb[22].mxu0 }
 0x3b9   :  { %v4001_v39 = vpop.f32.mrb[19].mxu1  ;;  %4019 = vmatmul.mubr.msk.f32.vlgmr.msra.gmra.mrb[28].mxu1 %vm300_vm4, %v807_v26  ;;  %v4064_v40 = vpop.f32.mrb[23].mxu0 }
 0x3ba   :  { %4021 = vmatprep.mubr.msk.f32.mxu1 %vm4873_vm0, %v4872_v0  ;;  %4575 = vmatpush3.bf16.msra.mxu1 %v5077_v41 }
 0x3bb   :  { %4582 = vmatprep.subr.bf16.mxu1 %v4874_v7 }
 0x3bc   :  { %v812_v42 = vpop.f32.mrb[20].mxu1  ;;  %v1122_v43 = vpop.f32.mrb[24].mxu0 }
 0x3bd   :  { %v4004_v44 = vpop.f32.mrb[21].mxu1  ;;  %4022 = vmatmul.mubr.msk.f32.gmra.mrb[30].mxu1 %vm300_vm4, %v812_v42  ;;  %v4067_v45 = vpop.f32.mrb[25].mxu0 }
 0x3be   :  { %4024 = vmatprep.mubr.msk.f32.mxu1 %vm4873_vm0, %v4872_v0 }
 0x3c0   :  { %v817_v46 = vpop.f32.mrb[22].mxu1  ;;  %v1127_v47 = vpop.f32.mrb[26].mxu0 }
 0x3c1   :  { %v4007_v48 = vpop.f32.mrb[23].mxu1  ;;  %4025 = vmatmul.mubr.msk.f32.gmra.mrb[32].mxu1 %vm300_vm4, %v817_v46  ;;  %v4070_v49 = vpop.f32.mrb[27].mxu0 }
 0x3c2   :  { %4027 = vmatprep.mubr.msk.f32.mxu1 %vm4873_vm0, %v4872_v0 }
 0x3c4   :  { %v822_v50 = vpop.f32.mrb[24].mxu1  ;;  %v1132_v51 = vpop.f32.mrb[28].mxu0 }
 0x3c5   :  { %v4010_v52 = vpop.f32.mrb[25].mxu1  ;;  %4028 = vmatmul.mubr.msk.f32.gmra.mrb[34].mxu1 %vm300_vm4, %v822_v50  ;;  %v4073_v53 = vpop.f32.mrb[29].mxu0 }
 0x3c6   :  { %4030 = vmatprep.mubr.msk.f32.mxu1 %vm4873_vm0, %v4872_v0 }
 0x3c8   :  { %v827_v54 = vpop.f32.mrb[26].mxu1  ;;  %v1137_v56 = vpop.f32.mrb[30].mxu0 }
 0x3c9   :  { %v4013_v57 = vpop.f32.mrb[27].mxu1  ;;  %4031 = vmatmul.mubr.msk.f32.gmra.mrb[36].mxu1 %vm300_vm4, %v827_v54  ;;  %v4076_v58 = vpop.f32.mrb[31].mxu0 }
 0x3ca   :  { %4037 = vmatprep.mubr.msk.f32.mxu1 %vm4873_vm0, %v4872_v0 }
 0x3cd   :  { %4038 = vmatmul.mubr.msk.f32.vlgmr.msra.gmra.mrb[28].mxu1 %vm300_vm4, %v736_v10 }
 0x3ce   :  { %4040 = vmatprep.mubr.msk.f32.mxu1 %vm4873_vm0, %v4872_v0  ;;  %4584 = vmatpush3.bf16.msra.mxu1 %v5102_v55 }
 0x3cf   :  { %4597 = vmatprep.subr.bf16.mxu1 %v4874_v7 }
 0x3d1   :  { %4041 = vmatmul.mubr.msk.f32.gmra.mrb[30].mxu1 %vm300_vm4, %v737_v11 }
 0x3d2   :  { %4043 = vmatprep.mubr.msk.f32.mxu1 %vm4873_vm0, %v4872_v0 }
 0x3d5   :  { %4044 = vmatmul.mubr.msk.f32.gmra.mrb[32].mxu1 %vm300_vm4, %v738_v19 }
 0x3d6   :  { %4046 = vmatprep.mubr.msk.f32.mxu1 %vm4873_vm0, %v4872_v0 }
 0x3d9   :  { %4047 = vmatmul.mubr.msk.f32.gmra.mrb[34].mxu1 %vm300_vm4, %v739_v20 }
 0x3da   :  { %4049 = vmatprep.mubr.msk.f32.mxu1 %vm4873_vm0, %v4872_v0 }
 0x3dd   :  { %4050 = vmatmul.mubr.msk.f32.gmra.mrb[36].mxu1 %vm300_vm4, %v5175_v25 }
 0x3de   :  { %4081 = vmatprep.mubr.msk.f32.mxu1 %vm4873_vm0, %v4872_v0 }
 0x3e1   :  { %4082 = vmatmul.mubr.msk.f32.vlgmr.msra.gmra.mrb[28].mxu1 %vm300_vm4, %v1117_v27 }
 0x3e2   :  { %4084 = vmatprep.mubr.msk.f32.mxu1 %vm4873_vm0, %v4872_v0 }
 0x3e5   :  { %4085 = vmatmul.mubr.msk.f32.gmra.mrb[30].mxu1 %vm300_vm4, %v1122_v43 }
 0x3e6   :  { %4087 = vmatprep.mubr.msk.f32.mxu1 %vm4873_vm0, %v4872_v0 }
 0x3e9   :  { %4088 = vmatmul.mubr.msk.f32.gmra.mrb[32].mxu1 %vm300_vm4, %v1127_v47 }
 0x3ea   :  { %4090 = vmatprep.mubr.msk.f32.mxu1 %vm4873_vm0, %v4872_v0 }
 0x3ed   :  { %4091 = vmatmul.mubr.msk.f32.gmra.mrb[34].mxu1 %vm300_vm4, %v1132_v51 }
 0x3ee   :  { %4093 = vmatprep.mubr.msk.f32.mxu1 %vm4873_vm0, %v4872_v0 }
 0x3f1   :  { %4094 = vmatmul.mubr.msk.f32.gmra.mrb[36].mxu1 %vm300_vm4, %v1137_v56 }
 0x3f2   :  { %4169 = vmatprep.mubr.msk.f32.mxu1 %vm4873_vm0, %v4872_v0 }
 0x4b4   :  { %v1222_v59 = vpop.f32.mrb[28].mxu1 }
 0x4b5   :  { %v4083_v60 = vpop.f32.mrb[29].mxu1  ;;  %v5282_v61 = vadd.f32 %v5144_v2, %v1222_v59 }
 0x4b7   :  { %v1251_v3 = vmax.f32 %v5282_v61, 0.0 }
 0x4b8   :  { %v1227_v62 = vpop.f32.mrb[30].mxu1 }
 0x4b9   :  { %v5285_v63 = vadd.f32 %v5144_v2, %v1227_v62  ;;  %v4086_v1 = vpop.f32.mrb[31].mxu1 }
 0x4bb   :  { %v1252_v4 = vmax.f32 %v5285_v63, 0.0 }
 0x4bc   :  { %v1232_v5 = vpop.f32.mrb[32].mxu1 }
 0x4bd   :  { %v4586_v6 = vpack.c.bf16 %v1252_v4, %v1251_v3  ;;  %v4089_v8 = vpop.f32.mrb[33].mxu1  ;;  %v5294_v9 = vadd.f32 %v5144_v2, %v1232_v5 }
 0x4bf   :  { %4587 = vmatpush3.bf16.msra.mxu0 %v4586_v6  ;;  %4599 = vmatpush3.bf16.msra.mxu1 %v4586_v6  ;;  %v1253_v13 = vmax.f32 %v5294_v9, 0.0 }
 0x4c0   :  { %v1237_v10 = vpop.f32.mrb[34].mxu1  ;;  %4588 = vmatprep.subr.bf16.mxu0 %v4874_v7  ;;  %4600 = vmatprep.subr.bf16.mxu1 %v4874_v7 }
 0x4c1   :  { %v5299_v11 = vadd.f32 %v5144_v2, %v1237_v10  ;;  %v4092_v12 = vpop.f32.mrb[35].mxu1 }
 0x4c3   :  { %v1254_v14 = vmax.f32 %v5299_v11, 0.0 }
 0x4c4   :  { %v1242_v15 = vpop.f32.mrb[36].mxu1 }
 0x4c5   :  { %v4589_v16 = vpack.c.bf16 %v1254_v14, %v1253_v13  ;;  %v4687_v17 = vadd.f32 %v5144_v2, %v1242_v15  ;;  %v4095_v18 = vpop.f32.mrb[37].mxu1 }
 0x4c7   :  { %4590 = vmatpush3.bf16.msra.mxu0 %v4589_v16  ;;  %4602 = vmatpush3.bf16.msra.mxu1 %v4589_v16  ;;  %v5310_v19 = vmax.f32 %v4687_v17, 0.0 }
 0x4c8   :  { %4104 = vmatprep.subr.mxu0 %v4872_v0  ;;  %4167 = vmatprep.subr.mxu1 %v4872_v0 }
 0x4cb   :  { %4105 = vmatpush3.msra.mxu0 %v5310_v19  ;;  %4168 = vmatpush3.msra.mxu1 %v5310_v19 }
 0x4cc   :  { %4107 = vmatmul.mubr.msk.f32.vlgmr.msra.gmra.mrb[32].mxu0 %vm194_vm3, %v4999_v28  ;;  %4170 = vmatmul.mubr.msk.f32.vlgmr.msra.gmra.mrb[38].mxu1 %vm194_vm3, %v5041_v34 }
 0x4cd   :  { %4109 = vmatprep.mubr.msk.f32.mxu0 %vm4873_vm0, %v4872_v0  ;;  %4172 = vmatprep.mubr.msk.f32.mxu1 %vm4873_vm0, %v4872_v0 }
 0x4ce   :  { %4591 = vmatprep.subr.bf16.mxu0 %v4874_v7  ;;  %4606 = vmatprep.subr.bf16.mxu1 %v4874_v7 }
 0x4cf   :  { %4593 = vmatpush3.bf16.msra.mxu0 %v5005_v30 }
 0x4d0   :  { %4110 = vmatmul.mubr.msk.f32.gmra.mrb[34].mxu0 %vm194_vm3, %v5001_v29  ;;  %4173 = vmatmul.mubr.msk.f32.gmra.mrb[40].mxu1 %vm194_vm3, %v5047_v35 }
 0x4d1   :  { %4112 = vmatprep.mubr.msk.f32.mxu0 %vm4873_vm0, %v4872_v0  ;;  %4175 = vmatprep.mubr.msk.f32.mxu1 %vm4873_vm0, %v4872_v0 }
 0x4d2   :  { %4594 = vmatprep.subr.bf16.mxu0 %v4874_v7 }
 0x4d4   :  { %4113 = vmatmul.mubr.msk.f32.gmra.mrb[36].mxu0 %vm194_vm3, %v5015_v31  ;;  %4176 = vmatmul.mubr.msk.f32.gmra.mrb[42].mxu1 %vm194_vm3, %v5053_v36 }
 0x4d5   :  { %4115 = vmatprep.mubr.msk.f32.mxu0 %vm4873_vm0, %v4872_v0  ;;  %4178 = vmatprep.mubr.msk.f32.mxu1 %vm4873_vm0, %v4872_v0 }
 0x4d8   :  { %4116 = vmatmul.mubr.msk.f32.gmra.mrb[38].mxu0 %vm194_vm3, %v5026_v32  ;;  %4179 = vmatmul.mubr.msk.f32.gmra.mrb[44].mxu1 %vm194_vm3, %v5059_v37 }
 0x4d9   :  { %4118 = vmatprep.mubr.msk.f32.mxu0 %vm4873_vm0, %v4872_v0  ;;  %4181 = vmatprep.mubr.msk.f32.mxu1 %vm4873_vm0, %v4872_v0 }
 0x4dc   :  { %4119 = vmatmul.mubr.msk.f32.gmra.mrb[40].mxu0 %vm194_vm3, %v5034_v33  ;;  %4182 = vmatmul.mubr.msk.f32.gmra.mrb[46].mxu1 %vm194_vm3, %v5065_v38 }
 0x4dd   :  { %4125 = vmatprep.mubr.msk.f32.mxu0 %vm4873_vm0, %v4872_v0  ;;  %4213 = vmatprep.mubr.msk.f32.mxu1 %vm4873_vm0, %v4872_v0 }
 0x59f   :  { %v1322_v20 = vpop.f32.mrb[32].mxu0  ;;  %v1632_v21 = vpop.f32.mrb[38].mxu1 }
 0x5a0   :  { %v4108_v22 = vpop.f32.mrb[33].mxu0  ;;  %4126 = vmatmul.mubr.msk.f32.vlgmr.msra.gmra.mrb[42].mxu0 %vm300_vm4, %v1322_v20  ;;  %v4171_v23 = vpop.f32.mrb[39].mxu1 }
 0x5a1   :  { %4128 = vmatprep.mubr.msk.f32.mxu0 %vm4873_vm0, %v4872_v0  ;;  %4596 = vmatpush3.bf16.msra.mxu0 %v5077_v41 }
 0x5a2   :  { %4603 = vmatprep.subr.bf16.mxu0 %v4874_v7 }
 0x5a3   :  { %v1327_v24 = vpop.f32.mrb[34].mxu0  ;;  %v1637_v25 = vpop.f32.mrb[40].mxu1 }
 0x5a4   :  { %v4111_v26 = vpop.f32.mrb[35].mxu0  ;;  %4129 = vmatmul.mubr.msk.f32.gmra.mrb[44].mxu0 %vm300_vm4, %v1327_v24  ;;  %v4174_v27 = vpop.f32.mrb[41].mxu1 }
 0x5a5   :  { %4131 = vmatprep.mubr.msk.f32.mxu0 %vm4873_vm0, %v4872_v0 }
 0x5a7   :  { %v1332_v39 = vpop.f32.mrb[36].mxu0  ;;  %v1642_v40 = vpop.f32.mrb[42].mxu1 }
 0x5a8   :  { %v4114_v42 = vpop.f32.mrb[37].mxu0  ;;  %4132 = vmatmul.mubr.msk.f32.gmra.mrb[46].mxu0 %vm300_vm4, %v1332_v39  ;;  %v4177_v43 = vpop.f32.mrb[43].mxu1 }
 0x5a9   :  { %4134 = vmatprep.mubr.msk.f32.mxu0 %vm4873_vm0, %v4872_v0 }
 0x5ab   :  { %v1337_v44 = vpop.f32.mrb[38].mxu0  ;;  %v1647_v45 = vpop.f32.mrb[44].mxu1 }
 0x5ac   :  { %v4117_v46 = vpop.f32.mrb[39].mxu0  ;;  %4135 = vmatmul.mubr.msk.f32.gmra.mrb[48].mxu0 %vm300_vm4, %v1337_v44  ;;  %v4180_v47 = vpop.f32.mrb[45].mxu1 }
 0x5ad   :  { %4137 = vmatprep.mubr.msk.f32.mxu0 %vm4873_vm0, %v4872_v0 }
 0x5af   :  { %v1342_v48 = vpop.f32.mrb[40].mxu0  ;;  %v1652_v49 = vpop.f32.mrb[46].mxu1 }
 0x5b0   :  { %v4120_v50 = vpop.f32.mrb[41].mxu0  ;;  %4138 = vmatmul.mubr.msk.f32.gmra.mrb[50].mxu0 %vm300_vm4, %v1342_v48  ;;  %v4183_v51 = vpop.f32.mrb[47].mxu1 }
 0x5b1   :  { %4144 = vmatprep.mubr.msk.f32.mxu0 %vm4873_vm0, %v4872_v0 }
 0x5b4   :  { %4145 = vmatmul.mubr.msk.f32.vlgmr.msra.gmra.mrb[42].mxu0 %vm300_vm4, %v1251_v3 }
 0x5b5   :  { %4147 = vmatprep.mubr.msk.f32.mxu0 %vm4873_vm0, %v4872_v0  ;;  %4605 = vmatpush3.bf16.msra.mxu0 %v5102_v55 }
 0x5b6   :  { %4618 = vmatprep.subr.bf16.mxu0 %v4874_v7 }
 0x5b8   :  { %4148 = vmatmul.mubr.msk.f32.gmra.mrb[44].mxu0 %vm300_vm4, %v1252_v4 }
 0x5b9   :  { %4150 = vmatprep.mubr.msk.f32.mxu0 %vm4873_vm0, %v4872_v0 }
 0x5bc   :  { %4151 = vmatmul.mubr.msk.f32.gmra.mrb[46].mxu0 %vm300_vm4, %v1253_v13 }
 0x5bd   :  { %4153 = vmatprep.mubr.msk.f32.mxu0 %vm4873_vm0, %v4872_v0 }
 0x5c0   :  { %4154 = vmatmul.mubr.msk.f32.gmra.mrb[48].mxu0 %vm300_vm4, %v1254_v14 }
 0x5c1   :  { %4156 = vmatprep.mubr.msk.f32.mxu0 %vm4873_vm0, %v4872_v0 }
 0x5c4   :  { %4157 = vmatmul.mubr.msk.f32.gmra.mrb[50].mxu0 %vm300_vm4, %v5310_v19 }
 0x5c5   :  { %4188 = vmatprep.mubr.msk.f32.mxu0 %vm4873_vm0, %v4872_v0 }
 0x5c8   :  { %4189 = vmatmul.mubr.msk.f32.vlgmr.msra.gmra.mrb[42].mxu0 %vm300_vm4, %v1632_v21 }
 0x5c9   :  { %4191 = vmatprep.mubr.msk.f32.mxu0 %vm4873_vm0, %v4872_v0 }
 0x5cc   :  { %4192 = vmatmul.mubr.msk.f32.gmra.mrb[44].mxu0 %vm300_vm4, %v1637_v25 }
 0x5cd   :  { %4194 = vmatprep.mubr.msk.f32.mxu0 %vm4873_vm0, %v4872_v0 }
 0x5d0   :  { %4195 = vmatmul.mubr.msk.f32.gmra.mrb[46].mxu0 %vm300_vm4, %v1642_v40 }
 0x5d1   :  { %4197 = vmatprep.mubr.msk.f32.mxu0 %vm4873_vm0, %v4872_v0 }
 0x5d4   :  { %4198 = vmatmul.mubr.msk.f32.gmra.mrb[48].mxu0 %vm300_vm4, %v1647_v45 }
 0x5d5   :  { %4200 = vmatprep.mubr.msk.f32.mxu0 %vm4873_vm0, %v4872_v0 }
 0x5d8   :  { %4201 = vmatmul.mubr.msk.f32.gmra.mrb[50].mxu0 %vm300_vm4, %v1652_v49 }
 0x5d9   :  { %4276 = vmatprep.mubr.msk.f32.mxu0 %vm4873_vm0, %v4872_v0 }
 0x69b   :  { %v1737_v52 = vpop.f32.mrb[42].mxu0 }
 0x69c   :  { %v4190_v53 = vpop.f32.mrb[43].mxu0  ;;  %v5417_v54 = vadd.f32 %v5144_v2, %v1737_v52 }
 0x69e   :  { %v1766_v59 = vmax.f32 %v5417_v54, 0.0 }
 0x69f   :  { %v1742_v56 = vpop.f32.mrb[44].mxu0 }
 0x6a0   :  { %v5420_v57 = vadd.f32 %v5144_v2, %v1742_v56  ;;  %v4193_v58 = vpop.f32.mrb[45].mxu0 }
 0x6a2   :  { %v1767_v60 = vmax.f32 %v5420_v57, 0.0 }
 0x6a3   :  { %v1747_v61 = vpop.f32.mrb[46].mxu0 }
 0x6a4   :  { %v4607_v62 = vpack.c.bf16 %v1767_v60, %v1766_v59  ;;  %v4196_v63 = vpop.f32.mrb[47].mxu0  ;;  %v5429_v1 = vadd.f32 %v5144_v2, %v1747_v61 }
 0x6a6   :  { %4608 = vmatpush3.bf16.msra.mxu1 %v4607_v62  ;;  %4620 = vmatpush3.bf16.msra.mxu0 %v4607_v62  ;;  %v1768_v6 = vmax.f32 %v5429_v1, 0.0 }
 0x6a7   :  { %v1752_v3 = vpop.f32.mrb[48].mxu0  ;;  %4609 = vmatprep.subr.bf16.mxu1 %v4874_v7  ;;  %4621 = vmatprep.subr.bf16.mxu0 %v4874_v7 }
 0x6a8   :  { %v5434_v4 = vadd.f32 %v5144_v2, %v1752_v3  ;;  %v4199_v5 = vpop.f32.mrb[49].mxu0 }
 0x6aa   :  { %v1769_v8 = vmax.f32 %v5434_v4, 0.0 }
 0x6ab   :  { %v1757_v9 = vpop.f32.mrb[50].mxu0 }
 0x6ac   :  { %v4610_v10 = vpack.c.bf16 %v1769_v8, %v1768_v6  ;;  %v4692_v11 = vadd.f32 %v5144_v2, %v1757_v9  ;;  %v4202_v12 = vpop.f32.mrb[51].mxu0 }
 0x6ae   :  { %4611 = vmatpush3.bf16.msra.mxu1 %v4610_v10  ;;  %4623 = vmatpush3.bf16.msra.mxu0 %v4610_v10  ;;  %v5445_v13 = vmax.f32 %v4692_v11, 0.0 }
 0x6af   :  { %4211 = vmatprep.subr.mxu1 %v4872_v0  ;;  %4274 = vmatprep.subr.mxu0 %v4872_v0 }
 0x6b2   :  { %4212 = vmatpush3.msra.mxu1 %v5445_v13  ;;  %4275 = vmatpush3.msra.mxu0 %v5445_v13 }
 0x6b3   :  { %4214 = vmatmul.mubr.msk.f32.vlgmr.msra.gmra.mrb[48].mxu1 %vm194_vm3, %v4999_v28  ;;  %4277 = vmatmul.mubr.msk.f32.vlgmr.msra.gmra.mrb[52].mxu0 %vm194_vm3, %v5041_v34 }
 0x6b4   :  { %4216 = vmatprep.mubr.msk.f32.mxu1 %vm4873_vm0, %v4872_v0  ;;  %4279 = vmatprep.mubr.msk.f32.mxu0 %vm4873_vm0, %v4872_v0 }
 0x6b5   :  { %4612 = vmatprep.subr.bf16.mxu1 %v4874_v7  ;;  %4627 = vmatprep.subr.bf16.mxu0 %v4874_v7 }
 0x6b6   :  { %4614 = vmatpush3.bf16.msra.mxu1 %v5005_v30 }
 0x6b7   :  { %4217 = vmatmul.mubr.msk.f32.gmra.mrb[50].mxu1 %vm194_vm3, %v5001_v29  ;;  %4280 = vmatmul.mubr.msk.f32.gmra.mrb[54].mxu0 %vm194_vm3, %v5047_v35 }
 0x6b8   :  { %4219 = vmatprep.mubr.msk.f32.mxu1 %vm4873_vm0, %v4872_v0  ;;  %4282 = vmatprep.mubr.msk.f32.mxu0 %vm4873_vm0, %v4872_v0 }
 0x6b9   :  { %4615 = vmatprep.subr.bf16.mxu1 %v4874_v7 }
 0x6bb   :  { %4220 = vmatmul.mubr.msk.f32.gmra.mrb[52].mxu1 %vm194_vm3, %v5015_v31  ;;  %4283 = vmatmul.mubr.msk.f32.gmra.mrb[56].mxu0 %vm194_vm3, %v5053_v36 }
 0x6bc   :  { %4222 = vmatprep.mubr.msk.f32.mxu1 %vm4873_vm0, %v4872_v0  ;;  %4285 = vmatprep.mubr.msk.f32.mxu0 %vm4873_vm0, %v4872_v0 }
 0x6bf   :  { %4223 = vmatmul.mubr.msk.f32.gmra.mrb[54].mxu1 %vm194_vm3, %v5026_v32  ;;  %4286 = vmatmul.mubr.msk.f32.gmra.mrb[58].mxu0 %vm194_vm3, %v5059_v37 }
 0x6c0   :  { %4225 = vmatprep.mubr.msk.f32.mxu1 %vm4873_vm0, %v4872_v0  ;;  %4288 = vmatprep.mubr.msk.f32.mxu0 %vm4873_vm0, %v4872_v0 }
 0x6c3   :  { %4226 = vmatmul.mubr.msk.f32.gmra.mrb[56].mxu1 %vm194_vm3, %v5034_v33  ;;  %4289 = vmatmul.mubr.msk.f32.gmra.mrb[60].mxu0 %vm194_vm3, %v5065_v38 }
 0x6c4   :  { %4232 = vmatprep.mubr.msk.f32.mxu1 %vm4873_vm0, %v4872_v0  ;;  %4320 = vmatprep.mubr.msk.f32.mxu0 %vm4873_vm0, %v4872_v0 }
 0x786   :  { %v1837_v14 = vpop.f32.mrb[48].mxu1  ;;  %v2147_v15 = vpop.f32.mrb[52].mxu0 }
 0x787   :  { %v4215_v16 = vpop.f32.mrb[49].mxu1  ;;  %4233 = vmatmul.mubr.msk.f32.vlgmr.msra.gmra.mrb[58].mxu1 %vm300_vm4, %v1837_v14  ;;  %v4278_v17 = vpop.f32.mrb[53].mxu0 }
 0x788   :  { %4235 = vmatprep.mubr.msk.f32.mxu1 %vm4873_vm0, %v4872_v0  ;;  %4617 = vmatpush3.bf16.msra.mxu1 %v5077_v41 }
 0x789   :  { %4624 = vmatprep.subr.bf16.mxu1 %v4874_v7 }
 0x78a   :  { %v1842_v18 = vpop.f32.mrb[50].mxu1  ;;  %v2152_v19 = vpop.f32.mrb[54].mxu0 }
 0x78b   :  { %v4218_v20 = vpop.f32.mrb[51].mxu1  ;;  %4236 = vmatmul.mubr.msk.f32.gmra.mrb[60].mxu1 %vm300_vm4, %v1842_v18  ;;  %v4281_v21 = vpop.f32.mrb[55].mxu0 }
 0x78c   :  { %4238 = vmatprep.mubr.msk.f32.mxu1 %vm4873_vm0, %v4872_v0 }
 0x78e   :  { %v1847_v22 = vpop.f32.mrb[52].mxu1  ;;  %v2157_v23 = vpop.f32.mrb[56].mxu0 }
 0x78f   :  { %v4221_v24 = vpop.f32.mrb[53].mxu1  ;;  %4239 = vmatmul.mubr.msk.f32.gmra.mrb[62].mxu1 %vm300_vm4, %v1847_v22  ;;  %v4284_v25 = vpop.f32.mrb[57].mxu0 }
 0x790   :  { %4241 = vmatprep.mubr.msk.f32.mxu1 %vm4873_vm0, %v4872_v0 }
 0x792   :  { %v1852_v26 = vpop.f32.mrb[54].mxu1  ;;  %v2162_v27 = vpop.f32.mrb[58].mxu0 }
 0x793   :  { %v4224_v39 = vpop.f32.mrb[55].mxu1  ;;  %4242 = vmatmul.mubr.msk.f32.gmra.mrb[64].mxu1 %vm300_vm4, %v1852_v26  ;;  %v4287_v40 = vpop.f32.mrb[59].mxu0 }
 0x794   :  { %4244 = vmatprep.mubr.msk.f32.mxu1 %vm4873_vm0, %v4872_v0 }
 0x796   :  { %v1857_v42 = vpop.f32.mrb[56].mxu1  ;;  %v2167_v43 = vpop.f32.mrb[60].mxu0 }
 0x797   :  { %v4227_v44 = vpop.f32.mrb[57].mxu1  ;;  %4245 = vmatmul.mubr.msk.f32.gmra.mrb[66].mxu1 %vm300_vm4, %v1857_v42  ;;  %v4290_v45 = vpop.f32.mrb[61].mxu0 }
 0x798   :  { %4251 = vmatprep.mubr.msk.f32.mxu1 %vm4873_vm0, %v4872_v0 }
 0x79b   :  { %4252 = vmatmul.mubr.msk.f32.vlgmr.msra.gmra.mrb[58].mxu1 %vm300_vm4, %v1766_v59 }
 0x79c   :  { %4254 = vmatprep.mubr.msk.f32.mxu1 %vm4873_vm0, %v4872_v0  ;;  %4626 = vmatpush3.bf16.msra.mxu1 %v5102_v55 }
 0x79d   :  { %4639 = vmatprep.subr.bf16.mxu1 %v4874_v7 }
 0x79f   :  { %4255 = vmatmul.mubr.msk.f32.gmra.mrb[60].mxu1 %vm300_vm4, %v1767_v60 }
 0x7a0   :  { %4257 = vmatprep.mubr.msk.f32.mxu1 %vm4873_vm0, %v4872_v0 }
 0x7a3   :  { %4258 = vmatmul.mubr.msk.f32.gmra.mrb[62].mxu1 %vm300_vm4, %v1768_v6 }
 0x7a4   :  { %4260 = vmatprep.mubr.msk.f32.mxu1 %vm4873_vm0, %v4872_v0 }
 0x7a7   :  { %4261 = vmatmul.mubr.msk.f32.gmra.mrb[64].mxu1 %vm300_vm4, %v1769_v8 }
 0x7a8   :  { %4263 = vmatprep.mubr.msk.f32.mxu1 %vm4873_vm0, %v4872_v0 }
 0x7ab   :  { %4264 = vmatmul.mubr.msk.f32.gmra.mrb[66].mxu1 %vm300_vm4, %v5445_v13 }
 0x7ac   :  { %4295 = vmatprep.mubr.msk.f32.mxu1 %vm4873_vm0, %v4872_v0 }
 0x7af   :  { %4296 = vmatmul.mubr.msk.f32.vlgmr.msra.gmra.mrb[58].mxu1 %vm300_vm4, %v2147_v15 }
 0x7b0   :  { %4298 = vmatprep.mubr.msk.f32.mxu1 %vm4873_vm0, %v4872_v0 }
 0x7b3   :  { %4299 = vmatmul.mubr.msk.f32.gmra.mrb[60].mxu1 %vm300_vm4, %v2152_v19 }
 0x7b4   :  { %4301 = vmatprep.mubr.msk.f32.mxu1 %vm4873_vm0, %v4872_v0 }
 0x7b7   :  { %4302 = vmatmul.mubr.msk.f32.gmra.mrb[62].mxu1 %vm300_vm4, %v2157_v23 }
 0x7b8   :  { %4304 = vmatprep.mubr.msk.f32.mxu1 %vm4873_vm0, %v4872_v0 }
 0x7bb   :  { %4305 = vmatmul.mubr.msk.f32.gmra.mrb[64].mxu1 %vm300_vm4, %v2162_v27 }
 0x7bc   :  { %4307 = vmatprep.mubr.msk.f32.mxu1 %vm4873_vm0, %v4872_v0 }
 0x7bf   :  { %4308 = vmatmul.mubr.msk.f32.gmra.mrb[66].mxu1 %vm300_vm4, %v2167_v43 }
 0x7c0   :  { %4383 = vmatprep.mubr.msk.f32.mxu1 %vm4873_vm0, %v4872_v0 }
 0x882   :  { %v2252_v46 = vpop.f32.mrb[58].mxu1 }
 0x883   :  { %v4297_v47 = vpop.f32.mrb[59].mxu1  ;;  %v5552_v48 = vadd.f32 %v5144_v2, %v2252_v46 }
 0x885   :  { %v2281_v52 = vmax.f32 %v5552_v48, 0.0 }
 0x886   :  { %v2257_v49 = vpop.f32.mrb[60].mxu1 }
 0x887   :  { %v5555_v50 = vadd.f32 %v5144_v2, %v2257_v49  ;;  %v4300_v51 = vpop.f32.mrb[61].mxu1 }
 0x889   :  { %v2282_v53 = vmax.f32 %v5555_v50, 0.0 }
 0x88a   :  { %v2262_v54 = vpop.f32.mrb[62].mxu1 }
 0x88b   :  { %v4628_v56 = vpack.c.bf16 %v2282_v53, %v2281_v52  ;;  %v4303_v57 = vpop.f32.mrb[63].mxu1  ;;  %v5564_v58 = vadd.f32 %v5144_v2, %v2262_v54  ;;  %v4837_v54 = vld [vmem:[#allocation2 + $0x58] sm:$0xff] }
 0x88c   :  { %v4839_v57 = vld [vmem:[#allocation2 + $0x60] sm:$0xff] }
 0x88d   :  { %4629 = vmatpush3.bf16.msra.mxu0 %v4628_v56  ;;  %4641 = vmatpush3.bf16.msra.mxu1 %v4628_v56  ;;  %v2283_v62 = vmax.f32 %v5564_v58, 0.0  ;;  %v4838_v56 = vld [vmem:[#allocation2 + $0x10] sm:$0xff]  ;;  %v4841_v58 = vld [vmem:[#allocation2 + $0x68] sm:$0xff] }
 0x88e   :  { %v2267_v59 = vpop.f32.mrb[64].mxu1  ;;  %4630 = vmatprep.subr.bf16.mxu0 %v4874_v7  ;;  %4642 = vmatprep.subr.bf16.mxu1 %v4874_v7 }
 0x88f   :  { %v5569_v60 = vadd.f32 %v5144_v2, %v2267_v59  ;;  %v4306_v61 = vpop.f32.mrb[65].mxu1  ;;  %v4842_v59 = vld [vmem:[#allocation2 + $0x20] sm:$0xff] }
 0x890   :  { %v70_v61 = vld [vmem:[%s5858_s5] sm:$0xff] }
 0x891   :  { %v2284_v63 = vmax.f32 %v5569_v60, 0.0  ;;  %v4843_v60 = vld [vmem:[#allocation2 + $0x70] sm:$0xff] }
 0x892   :  { %v2272_v1 = vpop.f32.mrb[66].mxu1 }
 0x893   :  { %v4631_v3 = vpack.c.bf16 %v2284_v63, %v2283_v62  ;;  %v4697_v4 = vadd.f32 %v5144_v2, %v2272_v1  ;;  %v4309_v5 = vpop.f32.mrb[67].mxu1 }
 0x895   :  { %4632 = vmatpush3.bf16.msra.mxu0 %v4631_v3  ;;  %4644 = vmatpush3.bf16.msra.mxu1 %v4631_v3  ;;  %v5580_v6 = vmax.f32 %v4697_v4, 0.0 }
 0x896   :  { %4318 = vmatprep.subr.mxu0 %v4872_v0  ;;  %4381 = vmatprep.subr.mxu1 %v4872_v0 }
 0x899   :  { %4319 = vmatpush3.msra.mxu0 %v5580_v6  ;;  %4382 = vmatpush3.msra.mxu1 %v5580_v6 }
 0x89a   :  { %4321 = vmatmul.mubr.msk.f32.vlgmr.msra.gmra.mrb[62].mxu0 %vm194_vm3, %v4999_v28  ;;  %4384 = vmatmul.mubr.msk.f32.vlgmr.msra.gmra.mrb[68].mxu1 %vm194_vm3, %v5041_v34 }
 0x89b   :  { %4323 = vmatprep.mubr.msk.f32.mxu0 %vm4873_vm0, %v4872_v0  ;;  %4386 = vmatprep.mubr.msk.f32.mxu1 %vm4873_vm0, %v4872_v0 }
 0x89c   :  { %4633 = vmatprep.subr.bf16.mxu0 %v4874_v7  ;;  %4648 = vmatprep.subr.bf16.mxu1 %v4874_v7 }
 0x89d   :  { %4635 = vmatpush3.bf16.msra.mxu0 %v5005_v30 }
 0x89e   :  { %4324 = vmatmul.mubr.msk.f32.gmra.mrb[64].mxu0 %vm194_vm3, %v5001_v29  ;;  %4387 = vmatmul.mubr.msk.f32.gmra.mrb[70].mxu1 %vm194_vm3, %v5047_v35 }
 0x89f   :  { %4326 = vmatprep.mubr.msk.f32.mxu0 %vm4873_vm0, %v4872_v0  ;;  %4389 = vmatprep.mubr.msk.f32.mxu1 %vm4873_vm0, %v4872_v0 }
 0x8a0   :  { %4636 = vmatprep.subr.bf16.mxu0 %v4874_v7 }
 0x8a2   :  { %4327 = vmatmul.mubr.msk.f32.gmra.mrb[66].mxu0 %vm194_vm3, %v5015_v31  ;;  %4390 = vmatmul.mubr.msk.f32.gmra.mrb[72].mxu1 %vm194_vm3, %v5053_v36 }
 0x8a3   :  { %4329 = vmatprep.mubr.msk.f32.mxu0 %vm4873_vm0, %v4872_v0  ;;  %4392 = vmatprep.mubr.msk.f32.mxu1 %vm4873_vm0, %v4872_v0 }
 0x8a6   :  { %4330 = vmatmul.mubr.msk.f32.gmra.mrb[68].mxu0 %vm194_vm3, %v5026_v32  ;;  %4393 = vmatmul.mubr.msk.f32.gmra.mrb[74].mxu1 %vm194_vm3, %v5059_v37 }
 0x8a7   :  { %4332 = vmatprep.mubr.msk.f32.mxu0 %vm4873_vm0, %v4872_v0  ;;  %4395 = vmatprep.mubr.msk.f32.mxu1 %vm4873_vm0, %v4872_v0 }
 0x8aa   :  { %4333 = vmatmul.mubr.msk.f32.gmra.mrb[70].mxu0 %vm194_vm3, %v5034_v33  ;;  %4396 = vmatmul.mubr.msk.f32.gmra.mrb[76].mxu1 %vm194_vm3, %v5065_v38 }
 0x8ab   :  { %4339 = vmatprep.mubr.msk.f32.mxu0 %vm4873_vm0, %v4872_v0  ;;  %4427 = vmatprep.mubr.msk.f32.mxu1 %vm4873_vm0, %v4872_v0 }
 0x96d   :  { %v2352_v28 = vpop.f32.mrb[62].mxu0  ;;  %v2662_v29 = vpop.f32.mrb[68].mxu1 }
 0x96e   :  { %v4322_v31 = vpop.f32.mrb[63].mxu0  ;;  %4340 = vmatmul.mubr.msk.f32.vlgmr.msra.gmra.mrb[72].mxu0 %vm300_vm4, %v2352_v28  ;;  %v4385_v32 = vpop.f32.mrb[69].mxu1 }
 0x96f   :  { %4342 = vmatprep.mubr.msk.f32.mxu0 %vm4873_vm0, %v4872_v0  ;;  %4638 = vmatpush3.bf16.msra.mxu0 %v5077_v41 }
 0x970   :  { %4645 = vmatprep.subr.bf16.mxu0 %v4874_v7 }
 0x971   :  { %v2357_v33 = vpop.f32.mrb[64].mxu0  ;;  %v2667_v34 = vpop.f32.mrb[70].mxu1 }
 0x972   :  { %v4325_v35 = vpop.f32.mrb[65].mxu0  ;;  %4343 = vmatmul.mubr.msk.f32.gmra.mrb[74].mxu0 %vm300_vm4, %v2357_v33  ;;  %v4388_v36 = vpop.f32.mrb[71].mxu1 }
 0x973   :  { %4345 = vmatprep.mubr.msk.f32.mxu0 %vm4873_vm0, %v4872_v0 }
 0x975   :  { %v2362_v37 = vpop.f32.mrb[66].mxu0  ;;  %v2672_v38 = vpop.f32.mrb[72].mxu1 }
 0x976   :  { %v4328_v8 = vpop.f32.mrb[67].mxu0  ;;  %4346 = vmatmul.mubr.msk.f32.gmra.mrb[76].mxu0 %vm300_vm4, %v2362_v37  ;;  %v4391_v9 = vpop.f32.mrb[73].mxu1 }
 0x977   :  { %4348 = vmatprep.mubr.msk.f32.mxu0 %vm4873_vm0, %v4872_v0 }
 0x979   :  { %v2367_v10 = vpop.f32.mrb[68].mxu0  ;;  %v2677_v11 = vpop.f32.mrb[74].mxu1 }
 0x97a   :  { %v4331_v12 = vpop.f32.mrb[69].mxu0  ;;  %4349 = vmatmul.mubr.msk.f32.gmra.mrb[78].mxu0 %vm300_vm4, %v2367_v10  ;;  %v4394_v13 = vpop.f32.mrb[75].mxu1 }
 0x97b   :  { %4351 = vmatprep.mubr.msk.f32.mxu0 %vm4873_vm0, %v4872_v0 }
 0x97d   :  { %v2372_v14 = vpop.f32.mrb[70].mxu0  ;;  %v2682_v15 = vpop.f32.mrb[76].mxu1 }
 0x97e   :  { %v4334_v16 = vpop.f32.mrb[71].mxu0  ;;  %4352 = vmatmul.mubr.msk.f32.gmra.mrb[80].mxu0 %vm300_vm4, %v2372_v14  ;;  %v4397_v17 = vpop.f32.mrb[77].mxu1 }
 0x97f   :  { %4358 = vmatprep.mubr.msk.f32.mxu0 %vm4873_vm0, %v4872_v0 }
 0x982   :  { %4359 = vmatmul.mubr.msk.f32.vlgmr.msra.gmra.mrb[72].mxu0 %vm300_vm4, %v2281_v52  ;;  %v4834_v52 = vld [vmem:[#allocation2] sm:$0xff] }
 0x983   :  { %4361 = vmatprep.mubr.msk.f32.mxu0 %vm4873_vm0, %v4872_v0  ;;  %4647 = vmatpush3.bf16.msra.mxu0 %v5102_v55 }
 0x984   :  { %4660 = vmatprep.subr.bf16.mxu0 %v4874_v7 }
 0x986   :  { %4362 = vmatmul.mubr.msk.f32.gmra.mrb[74].mxu0 %vm300_vm4, %v2282_v53  ;;  %v4835_v53 = vld [vmem:[#allocation2 + $0x50] sm:$0xff] }
 0x987   :  { %4364 = vmatprep.mubr.msk.f32.mxu0 %vm4873_vm0, %v4872_v0 }
 0x98a   :  { %4365 = vmatmul.mubr.msk.f32.gmra.mrb[76].mxu0 %vm300_vm4, %v2283_v62  ;;  %v71_v62 = vld [vmem:[%s5858_s5 + $0x8] sm:$0xff] }
 0x98b   :  { %4367 = vmatprep.mubr.msk.f32.mxu0 %vm4873_vm0, %v4872_v0 }
 0x98e   :  { %4368 = vmatmul.mubr.msk.f32.gmra.mrb[78].mxu0 %vm300_vm4, %v2284_v63  ;;  %v4670_v63 = vpack.c.bf16 %v71_v62, %v70_v61 }
 0x98f   :  { %4370 = vmatprep.mubr.msk.f32.mxu0 %vm4873_vm0, %v4872_v0 }
 0x992   :  { %4371 = vmatmul.mubr.msk.f32.gmra.mrb[80].mxu0 %vm300_vm4, %v5580_v6 }
 0x993   :  { %4402 = vmatprep.mubr.msk.f32.mxu0 %vm4873_vm0, %v4872_v0 }
 0x996   :  { %4403 = vmatmul.mubr.msk.f32.vlgmr.msra.gmra.mrb[72].mxu0 %vm300_vm4, %v2662_v29 }
 0x997   :  { %4405 = vmatprep.mubr.msk.f32.mxu0 %vm4873_vm0, %v4872_v0 }
 0x99a   :  { %4406 = vmatmul.mubr.msk.f32.gmra.mrb[74].mxu0 %vm300_vm4, %v2667_v34 }
 0x99b   :  { %4408 = vmatprep.mubr.msk.f32.mxu0 %vm4873_vm0, %v4872_v0 }
 0x99e   :  { %4409 = vmatmul.mubr.msk.f32.gmra.mrb[76].mxu0 %vm300_vm4, %v2672_v38 }
 0x99f   :  { %4411 = vmatprep.mubr.msk.f32.mxu0 %vm4873_vm0, %v4872_v0 }
 0x9a2   :  { %4412 = vmatmul.mubr.msk.f32.gmra.mrb[78].mxu0 %vm300_vm4, %v2677_v11  ;;  %v4844_v11 = vld [vmem:[%s5857_s4] ss:$0 sm:$0xff] }
 0x9a3   :  { %4414 = vmatprep.mubr.msk.f32.mxu0 %vm4873_vm0, %v4872_v0 }
 0x9a6   :  { %4415 = vmatmul.mubr.msk.f32.gmra.mrb[80].mxu0 %vm300_vm4, %v2682_v15 }
 0x9a7   :  { %4490 = vmatprep.mubr.msk.f32.mxu0 %vm4873_vm0, %v4872_v0 }
 0xa69   :  { %v2767_v18 = vpop.f32.mrb[72].mxu0 }
 0xa6a   :  { %v4404_v19 = vpop.f32.mrb[73].mxu0  ;;  %v5687_v20 = vadd.f32 %v5144_v2, %v2767_v18 }
 0xa6c   :  { %v2796_v24 = vmax.f32 %v5687_v20, 0.0 }
 0xa6d   :  { %v2772_v21 = vpop.f32.mrb[74].mxu0 }
 0xa6e   :  { %v5690_v22 = vadd.f32 %v5144_v2, %v2772_v21  ;;  %v4407_v23 = vpop.f32.mrb[75].mxu0 }
 0xa70   :  { %v2797_v25 = vmax.f32 %v5690_v22, 0.0 }
 0xa71   :  { %v2777_v26 = vpop.f32.mrb[76].mxu0 }
 0xa72   :  { %v4649_v27 = vpack.c.bf16 %v2797_v25, %v2796_v24  ;;  %v4410_v39 = vpop.f32.mrb[77].mxu0  ;;  %v5699_v40 = vadd.f32 %v5144_v2, %v2777_v26 }
 0xa74   :  { %4650 = vmatpush3.bf16.msra.mxu1 %v4649_v27  ;;  %4662 = vmatpush3.bf16.msra.mxu0 %v4649_v27  ;;  %v2798_v45 = vmax.f32 %v5699_v40, 0.0 }
 0xa75   :  { %v2782_v42 = vpop.f32.mrb[78].mxu0  ;;  %4651 = vmatprep.subr.bf16.mxu1 %v4874_v7  ;;  %4663 = vmatprep.subr.bf16.mxu0 %v4874_v7 }
 0xa76   :  { %v5704_v43 = vadd.f32 %v5144_v2, %v2782_v42  ;;  %v4413_v44 = vpop.f32.mrb[79].mxu0 }
 0xa78   :  { %v2799_v46 = vmax.f32 %v5704_v43, 0.0  ;;  %v3600_v43 = vld [vmem:[%s5859_s6] ss:$0 sm:$0xff] }
 0xa79   :  { %v2787_v47 = vpop.f32.mrb[80].mxu0 }
 0xa7a   :  { %v4652_v48 = vpack.c.bf16 %v2799_v46, %v2798_v45  ;;  %v4702_v49 = vadd.f32 %v5144_v2, %v2787_v47  ;;  %v4416_v50 = vpop.f32.mrb[81].mxu0  ;;  %v4836_v2 = vld [vmem:[#allocation2 + $0x8] sm:$0xff] }
 0xa7c   :  { %4653 = vmatpush3.bf16.msra.mxu1 %v4652_v48  ;;  %4665 = vmatpush3.bf16.msra.mxu0 %v4652_v48  ;;  %v5715_v51 = vmax.f32 %v4702_v49, 0.0 }
 0xa7d   :  { %4425 = vmatprep.subr.mxu1 %v4872_v0  ;;  %4488 = vmatprep.subr.mxu0 %v4872_v0 }
 0xa80   :  { %4426 = vmatpush3.msra.mxu1 %v5715_v51  ;;  %4489 = vmatpush3.msra.mxu0 %v5715_v51 }
 0xa81   :  { %4428 = vmatmul.mubr.msk.f32.vlgmr.msra.gmra.mrb[78].mxu1 %vm194_vm3, %v4834_v52  ;;  %4491 = vmatmul.mubr.msk.f32.vlgmr.msra.gmra.mrb[82].mxu0 %vm194_vm3, %v4835_v53 }
 0xa82   :  { %4430 = vmatprep.mubr.msk.f32.mxu1 %vm4873_vm0, %v4872_v0  ;;  %4493 = vmatprep.mubr.msk.f32.mxu0 %vm4873_vm0, %v4872_v0 }
 0xa83   :  { %4654 = vmatprep.subr.bf16.mxu1 %v4874_v7  ;;  %4669 = vmatprep.subr.bf16.mxu0 %v4874_v7 }
 0xa84   :  { %4656 = vmatpush3.bf16.msra.mxu1 %v5005_v30  ;;  %v4840_v30 = vld [vmem:[#allocation2 + $0x18] sm:$0xff]  ;;  %4671 = vmatpush3.bf16.msra.mxu0 %v4670_v63 }
 0xa85   :  { %4431 = vmatmul.mubr.msk.f32.gmra.mrb[80].mxu1 %vm194_vm3, %v4836_v2  ;;  %4494 = vmatmul.mubr.msk.f32.gmra.mrb[84].mxu0 %vm194_vm3, %v4837_v54 }
 0xa86   :  { %4433 = vmatprep.mubr.msk.f32.mxu1 %vm4873_vm0, %v4872_v0  ;;  %4496 = vmatprep.mubr.msk.f32.mxu0 %vm4873_vm0, %v4872_v0 }
 0xa87   :  { %4657 = vmatprep.subr.bf16.mxu1 %v4874_v7 }
 0xa89   :  { %4434 = vmatmul.mubr.msk.f32.gmra.mrb[82].mxu1 %vm194_vm3, %v4838_v56  ;;  %4497 = vmatmul.mubr.msk.f32.gmra.mrb[86].mxu0 %vm194_vm3, %v4839_v57 }
 0xa8a   :  { %4436 = vmatprep.mubr.msk.f32.mxu1 %vm4873_vm0, %v4872_v0  ;;  %4499 = vmatprep.mubr.msk.f32.mxu0 %vm4873_vm0, %v4872_v0 }
 0xa8d   :  { %4437 = vmatmul.mubr.msk.f32.gmra.mrb[84].mxu1 %vm194_vm3, %v4840_v30  ;;  %4500 = vmatmul.mubr.msk.f32.gmra.mrb[88].mxu0 %vm194_vm3, %v4841_v58 }
 0xa8e   :  { %4439 = vmatprep.mubr.msk.f32.mxu1 %vm4873_vm0, %v4872_v0  ;;  %4502 = vmatprep.mubr.msk.f32.mxu0 %vm4873_vm0, %v4872_v0 }
 0xa91   :  { %4440 = vmatmul.mubr.msk.f32.gmra.mrb[86].mxu1 %vm194_vm3, %v4842_v59  ;;  %4503 = vmatmul.mubr.msk.f32.gmra.mrb[90].mxu0 %vm194_vm3, %v4843_v60 }
 0xa92   :  { %4446 = vmatprep.mubr.msk.f32.mxu1 %vm4873_vm0, %v4872_v0  ;;  %4528 = vmatprep.mubr.msk.f32.mxu0 %vm4873_vm0, %v4872_v0 }
 0xb54   :  { %v2867_v1 = vpop.f32.mrb[78].mxu1  ;;  %v3177_v3 = vpop.f32.mrb[82].mxu0 }
 0xb55   :  { %4447 = vmatmul.mubr.msk.f32.vlgmr.msra.gmra.mrb[88].mxu1 %vm300_vm4, %v2867_v1  ;;  %v4429_v4 = vpop.f32.mrb[79].mxu1  ;;  %v4492_v5 = vpop.f32.mrb[83].mxu0 }
 0xb56   :  { %4449 = vmatprep.mubr.msk.f32.mxu1 %vm4873_vm0, %v4872_v0  ;;  %4659 = vmatpush3.bf16.msra.mxu1 %v5077_v41 }
 0xb57   :  { %4666 = vmatprep.subr.bf16.mxu1 %v4874_v7 }
 0xb58   :  { %v2872_v6 = vpop.f32.mrb[80].mxu1  ;;  %v3182_v28 = vpop.f32.mrb[84].mxu0 }
 0xb59   :  { %4450 = vmatmul.mubr.msk.f32.gmra.mrb[90].mxu1 %vm300_vm4, %v2872_v6  ;;  %v4432_v29 = vpop.f32.mrb[81].mxu1  ;;  %v4495_v31 = vpop.f32.mrb[85].mxu0 }
 0xb5a   :  { %4452 = vmatprep.mubr.msk.f32.mxu1 %vm4873_vm0, %v4872_v0 }
 0xb5c   :  { %v2877_v32 = vpop.f32.mrb[82].mxu1  ;;  %v3187_v33 = vpop.f32.mrb[86].mxu0 }
 0xb5d   :  { %4453 = vmatmul.mubr.msk.f32.gmra.mrb[92].mxu1 %vm300_vm4, %v2877_v32  ;;  %v4435_v34 = vpop.f32.mrb[83].mxu1  ;;  %v4498_v35 = vpop.f32.mrb[87].mxu0 }
 0xb5e   :  { %4455 = vmatprep.mubr.msk.f32.mxu1 %vm4873_vm0, %v4872_v0 }
 0xb60   :  { %v2882_v41 = vpop.f32.mrb[84].mxu1  ;;  %v3192_v7 = vpop.f32.mrb[88].mxu0 }
 0xb61   :  { %4456 = vmatmul.mubr.msk.f32.gmra.mrb[94].mxu1 %vm300_vm4, %v2882_v41  ;;  %v4438_v36 = vpop.f32.mrb[85].mxu1  ;;  %v4501_v37 = vpop.f32.mrb[89].mxu0 }
 0xb62   :  { %4458 = vmatprep.mubr.msk.f32.mxu1 %vm4873_vm0, %v4872_v0 }
 0xb64   :  { %v2887_v38 = vpop.f32.mrb[86].mxu1  ;;  %v3197_v8 = vpop.f32.mrb[90].mxu0 }
 0xb65   :  { %4459 = vmatmul.mubr.msk.f32.gmra.mrb[96].mxu1 %vm300_vm4, %v2887_v38  ;;  %v4441_v9 = vpop.f32.mrb[87].mxu1  ;;  %v4504_v10 = vpop.f32.mrb[91].mxu0 }
 0xb66   :  { %4465 = vmatprep.mubr.msk.f32.mxu1 %vm4873_vm0, %v4872_v0 }
 0xb69   :  { %4466 = vmatmul.mubr.msk.f32.vlgmr.msra.gmra.mrb[88].mxu1 %vm300_vm4, %v2796_v24 }
 0xb6a   :  { %4468 = vmatprep.mubr.msk.f32.mxu1 %vm4873_vm0, %v4872_v0  ;;  %4668 = vmatpush3.bf16.msra.mxu1 %v5102_v55 }
 0xb6d   :  { %4469 = vmatmul.mubr.msk.f32.gmra.mrb[90].mxu1 %vm300_vm4, %v2797_v25 }
 0xb6e   :  { %4471 = vmatprep.mubr.msk.f32.mxu1 %vm4873_vm0, %v4872_v0 }
 0xb71   :  { %4472 = vmatmul.mubr.msk.f32.gmra.mrb[92].mxu1 %vm300_vm4, %v2798_v45 }
 0xb72   :  { %4474 = vmatprep.mubr.msk.f32.mxu1 %vm4873_vm0, %v4872_v0 }
 0xb75   :  { %4475 = vmatmul.mubr.msk.f32.gmra.mrb[94].mxu1 %vm300_vm4, %v2799_v46 }
 0xb76   :  { %4477 = vmatprep.mubr.msk.f32.mxu1 %vm4873_vm0, %v4872_v0 }
 0xb79   :  { %4478 = vmatmul.mubr.msk.f32.gmra.mrb[96].mxu1 %vm300_vm4, %v5715_v51 }
 0xb7a   :  { %4509 = vmatprep.mubr.msk.f32.mxu1 %vm4873_vm0, %v4872_v0 }
 0xb7d   :  { %4510 = vmatmul.mubr.msk.f32.vlgmr.msra.gmra.mrb[88].mxu1 %vm300_vm4, %v3177_v3 }
 0xb7e   :  { %4512 = vmatprep.mubr.msk.f32.mxu1 %vm4873_vm0, %v4872_v0 }
 0xb81   :  { %4513 = vmatmul.mubr.msk.f32.gmra.mrb[90].mxu1 %vm300_vm4, %v3182_v28 }
 0xb82   :  { %4515 = vmatprep.mubr.msk.f32.mxu1 %vm4873_vm0, %v4872_v0 }
 0xb85   :  { %4516 = vmatmul.mubr.msk.f32.gmra.mrb[92].mxu1 %vm300_vm4, %v3187_v33 }
 0xb86   :  { %4518 = vmatprep.mubr.msk.f32.mxu1 %vm4873_vm0, %v4872_v0 }
 0xb89   :  { %4519 = vmatmul.mubr.msk.f32.gmra.mrb[94].mxu1 %vm300_vm4, %v3192_v7 }
 0xb8a   :  { %4521 = vmatprep.mubr.msk.f32.mxu1 %vm4873_vm0, %v4872_v0 }
 0xb8d   :  { %4522 = vmatmul.mubr.msk.f32.gmra.mrb[96].mxu1 %vm300_vm4, %v3197_v8 }
 0xc50   :  { %v3282_v55 = vpop.f32.mrb[88].mxu1 }
 0xc51   :  { %v4703_v12 = vadd.f32 %v4844_v11, %v3282_v55  ;;  %v4511_v13 = vpop.f32.mrb[89].mxu1 }
 0xc53   :  { %v3311_v14 = vmax.f32 %v4703_v12, 0.0 }
 0xc54   :  { %v3287_v15 = vpop.f32.mrb[90].mxu1 }
 0xc55   :  { %v4704_v16 = vadd.f32 %v4844_v11, %v3287_v15  ;;  %v4514_v17 = vpop.f32.mrb[91].mxu1  ;;  %4529 = vmatmul.mubr.msk.f32.vlgmr.msra.gmra.mrb[92].mxu0 %vm300_vm4, %v3311_v14 }
 0xc56   :  { %4531 = vmatprep.mubr.msk.f32.mxu0 %vm4873_vm0, %v4872_v0 }
 0xc57   :  { %v3312_v18 = vmax.f32 %v4704_v16, 0.0 }
 0xc58   :  { %v3292_v19 = vpop.f32.mrb[92].mxu1 }
 0xc59   :  { %v4705_v20 = vadd.f32 %v4844_v11, %v3292_v19  ;;  %v4517_v21 = vpop.f32.mrb[93].mxu1  ;;  %4532 = vmatmul.mubr.msk.f32.gmra.mrb[94].mxu0 %vm300_vm4, %v3312_v18 }
 0xc5a   :  { %4534 = vmatprep.mubr.msk.f32.mxu0 %vm4873_vm0, %v4872_v0 }
 0xc5b   :  { %v3313_v22 = vmax.f32 %v4705_v20, 0.0 }
 0xc5c   :  { %v3297_v23 = vpop.f32.mrb[94].mxu1 }
 0xc5d   :  { %v4706_v24 = vadd.f32 %v4844_v11, %v3297_v23  ;;  %v4520_v25 = vpop.f32.mrb[95].mxu1  ;;  %4535 = vmatmul.mubr.msk.f32.gmra.mrb[96].mxu0 %vm300_vm4, %v3313_v22 }
 0xc5e   :  { %4537 = vmatprep.mubr.msk.f32.mxu0 %vm4873_vm0, %v4872_v0 }
 0xc5f   :  { %v3314_v26 = vmax.f32 %v4706_v24, 0.0 }
 0xc60   :  { %v3302_v27 = vpop.f32.mrb[96].mxu1 }
 0xc61   :  { %v4707_v39 = vadd.f32 %v4844_v11, %v3302_v27  ;;  %v4523_v40 = vpop.f32.mrb[97].mxu1  ;;  %4538 = vmatmul.mubr.msk.f32.gmra.mrb[98].mxu0 %vm300_vm4, %v3314_v26 }
 0xc62   :  { %4540 = vmatprep.mubr.msk.f32.mxu0 %vm4873_vm0, %v4872_v0 }
 0xc63   :  { %v3315_v42 = vmax.f32 %v4707_v39, 0.0 }
 0xc65   :  { %4541 = vmatmul.mubr.msk.f32.gmra.mrb[100].mxu0 %vm300_vm4, %v3315_v42 }
 0xd28   :  { %v3404_v44 = vpop.f32.mrb[92].mxu0 }
 0xd29   :  { %v3405_v45 = vadd.f32 %v3600_v43, %v3404_v44  ;;  %v4530_v46 = vpop.f32.mrb[93].mxu0 }
 0xd2b   :  { %3428 = vst.msk [vmem:[%s5861_s8] sm:$0xff] %vm84_vm2, %v3405_v45 }
 0xd2c   :  { %v3409_v47 = vpop.f32.mrb[94].mxu0 }
 0xd2d   :  { %v3410_v48 = vadd.f32 %v3600_v43, %v3409_v47  ;;  %v4533_v49 = vpop.f32.mrb[95].mxu0 }
 0xd2f   :  { %3429 = vst.msk [vmem:[%s5861_s8 + $0x8] sm:$0xff] %vm84_vm2, %v3410_v48 }
 0xd30   :  { %v3414_v0 = vpop.f32.mrb[96].mxu0 }
 0xd31   :  { %v3415_v50 = vadd.f32 %v3600_v43, %v3414_v0  ;;  %v4536_v51 = vpop.f32.mrb[97].mxu0 }
 0xd33   :  { %3430 = vst.msk [vmem:[%s5861_s8 + $0x10] sm:$0xff] %vm84_vm2, %v3415_v50 }
 0xd34   :  { %v3419_v52 = vpop.f32.mrb[98].mxu0 }
 0xd35   :  { %v3420_v53 = vadd.f32 %v3600_v43, %v3419_v52  ;;  %v4539_v2 = vpop.f32.mrb[99].mxu0 }
 0xd37   :  { %3431 = vst.msk [vmem:[%s5861_s8 + $0x18] sm:$0xff] %vm84_vm2, %v3420_v53 }
 0xd38   :  { %v3424_v54 = vpop.f32.mrb[100].mxu0 }
 0xd39   :  { %v3425_v56 = vadd.f32 %v3600_v43, %v3424_v54  ;;  %v4542_v57 = vpop.f32.mrb[101].mxu0 }
 0xd3b   :  { %3432 = vst.msk [vmem:[%s5861_s8 + $0x20] sm:$0xff] %vm84_vm2, %v3425_v56 }
 0xd3c   :  { %3437 = vsyncpa [#allocation3], 1 }

</bundles_post_ra>
